<compile_context>
chip_gen: v5e
topology: v5e:2x2
jax: 0.10.0
libtpu: 0.0.40
codegen_flags: <defaults>
</compile_context>

<pallas_src>
import jax
import jax.numpy as jnp
from jax.experimental import pallas as pl
from jax.experimental.pallas import tpu as pltpu

EPS = 1e-5


# ------------------------------ Pallas kernel -------------------------------

def fused_up_kernel(x_ref, ah3_ref, m1_ref, p3_ref, wb2_ref,
                    g1_ref, be1_ref, g2_ref, be2_ref, sel_ref, o_ref):
    """Fused upsample + conv1 + BN1 + ReLU + conv2 + BN2 + ReLU.

    x_ref   : (N, H, W*Cin)            input in channel-last, width*channels fused
    ah3_ref : (3, H2, H)               (P_dy @ Ah)  height-shifted upsample rows
    m1_ref  : (3, W*Cin, W2*Cout)      (AwI @ Wband1_dy)  upsample folded into conv1
    p3_ref  : (3, H2, H2)              height shift-with-zero-pad matrices for conv2
    wb2_ref : (3, W2*Cout, W2*Cout)    banded conv2 weights (width taps + width pad)
    g*_ref, be*_ref : (1, W2*Cout)     gamma / beta tiled into the lane layout
    sel_ref : (W2*Cout, Cout)          channel selector (lane index -> channel)
    o_ref   : (N, H2, W2*Cout)
    """
    f32 = jnp.float32
    n_img, h2, wco = o_ref.shape
    cout = sel_ref.shape[1]
    w2 = wco // cout
    inv_count = 1.0 / float(n_img * h2 * w2)      # BN: biased variance over N*H*W

    sel = sel_ref[...]

    def bn_scale_shift(col_sum, col_sumsq, gamma_lane, beta_lane):
        # per-channel stats via selector matmul (stays lane-dense, no relayouts)
        ch_sum = jnp.dot(col_sum, sel, preferred_element_type=f32)      # (1, Cout)
        ch_sumsq = jnp.dot(col_sumsq, sel, preferred_element_type=f32)  # (1, Cout)
        mean = ch_sum * inv_count
        var = ch_sumsq * inv_count - mean * mean                        # E[y^2]-E[y]^2
        inv_std = jax.lax.rsqrt(var + EPS)
        # broadcast back to the (1, W2*Cout) lane layout
        mean_l = jax.lax.dot_general(mean, sel, (((1,), (1,)), ((), ())),
                                     preferred_element_type=f32)
        inv_l = jax.lax.dot_general(inv_std, sel, (((1,), (1,)), ((), ())),
                                    preferred_element_type=f32)
        scale = gamma_lane * inv_l
        shift = beta_lane - mean_l * scale
        return scale, shift

    # ---- Stage 1: bilinear upsample folded into conv1 (conv bias cancelled by BN)
    y1 = []
    cs1 = jnp.zeros((1, wco), f32)
    css1 = jnp.zeros((1, wco), f32)
    for n in range(n_img):
        xn = x_ref[n]                                              # (H, W*Cin)
        acc = jnp.zeros((h2, wco), f32)
        for dy in range(3):
            t = jnp.dot(ah3_ref[dy], xn, preferred_element_type=f32)   # (H2, W*Cin)
            acc = acc + jnp.dot(t, m1_ref[dy], preferred_element_type=f32)
        y1.append(acc)
        cs1 = cs1 + jnp.sum(acc, axis=0, keepdims=True)
        css1 = css1 + jnp.sum(acc * acc, axis=0, keepdims=True)
    scale1, shift1 = bn_scale_shift(cs1, css1, g1_ref[...], be1_ref[...])

    # ---- Stage 2: conv2 on ReLU(BN(y1)); height taps via shift-matmul (zero pad)
    y2 = []
    cs2 = jnp.zeros((1, wco), f32)
    css2 = jnp.zeros((1, wco), f32)
    for n in range(n_img):
        a = jnp.maximum(y1[n] * scale1 + shift1, 0.0)              # (H2, W2*Cout)
        acc = jnp.zeros((h2, wco), f32)
        for dy in range(3):
            sh = jnp.dot(p3_ref[dy], a, preferred_element_type=f32)    # (H2, W2*Cout)
            acc = acc + jnp.dot(sh, wb2_ref[dy], preferred_element_type=f32)
        y2.append(acc)
        cs2 = cs2 + jnp.sum(acc, axis=0, keepdims=True)
        css2 = css2 + jnp.sum(acc * acc, axis=0, keepdims=True)
    scale2, shift2 = bn_scale_shift(cs2, css2, g2_ref[...], be2_ref[...])

    for n in range(n_img):
        o_ref[n] = jnp.maximum(y2[n] * scale2 + shift2, 0.0).astype(o_ref.dtype)


# ------------------------------- JAX wrapper ---------------------------------

def bilinear_matrix(n_in, n_out):
    """Interpolation matrix A (n_out, n_in) for align_corners=True (as in the module)."""
    idx = jnp.arange(n_out)
    scale = (n_in - 1) / (n_out - 1) if n_out > 1 else 0.0
    src = idx.astype(jnp.float32) * scale
    lo = jnp.clip(jnp.floor(src).astype(jnp.int32), 0, max(n_in - 2, 0))
    frac = src - lo.astype(jnp.float32)
    a = jnp.zeros((n_out, n_in), jnp.float32)
    a = a.at[idx, lo].add(1.0 - frac)
    a = a.at[idx, jnp.minimum(lo + 1, n_in - 1)].add(frac)
    return a


def band_weights(w_oihw, width):
    """(Cout, Cin, 3, 3) -> (3, width*Cin, width*Cout) banded matrices.

    band[dy, w_in*Cin+ci, w_out*Cout+co] = W[co, ci, dy, w_in-w_out+1]
    (zero outside the +-1 band => width zero-padding is implicit)."""
    w_oihw = w_oihw.astype(jnp.float32)
    bands = []
    for dy in range(3):
        acc = jnp.zeros((width * w_oihw.shape[1], width * w_oihw.shape[0]),
                        jnp.float32)
        for dx in range(3):
            shift = jnp.eye(width, k=1 - dx, dtype=jnp.float32)
            acc = acc + jnp.kron(shift, w_oihw[:, :, dy, dx].T)
        bands.append(acc)
    return jnp.stack(bands, axis=0)


def up_forward(params, x):
    """Forward of `up(in_ch, out_ch, bilinear=True)`. x: (N, in_ch, H, W) -> NCHW out."""
    n, cin, h, w = x.shape
    h2, w2 = 2 * h, 2 * w
    cout = params["w1"].shape[0]
    f32 = jnp.float32

    # --- fold upsample + conv taps into dense operands (wrapper-side, exact f32)
    ah = bilinear_matrix(h, h2)                                    # (H2, H)
    aw = bilinear_matrix(w, w2)                                    # (W2, W)
    p3 = jnp.stack([jnp.eye(h2, k=dy - 1, dtype=f32) for dy in range(3)])  # (3,H2,H2)
    ah3 = jnp.einsum("dab,bc->dac", p3, ah, precision="highest")   # (3, H2, H)
    awi = jnp.kron(aw.T, jnp.eye(cin, dtype=f32))                  # (W*Cin, W2*Cin)
    wb1 = band_weights(params["w1"], w2)                           # (3, W2*Cin, W2*Cout)
    m1 = jnp.einsum("ab,dbc->dac", awi, wb1, precision="highest")  # (3, W*Cin, W2*Cout)
    wb2 = band_weights(params["w2"], w2)                           # (3, W2*Cout, W2*Cout)
    sel = jnp.kron(jnp.ones((w2, 1), f32), jnp.eye(cout, dtype=f32))  # (W2*Cout, Cout)

    # per-channel affine params tiled into the (w, c)-fused lane layout
    g1l = jnp.tile(params["g1"].astype(f32), w2).reshape(1, w2 * cout)
    be1l = jnp.tile(params["beta1"].astype(f32), w2).reshape(1, w2 * cout)
    g2l = jnp.tile(params["g2"].astype(f32), w2).reshape(1, w2 * cout)
    be2l = jnp.tile(params["beta2"].astype(f32), w2).reshape(1, w2 * cout)
    # NOTE: conv biases b1/b2 are intentionally NOT passed: BN (batch stats)
    # subtracts the batch mean, which cancels a per-channel bias exactly.

    # module boundary: NCHW -> channel-last with width*channels fused (lane-dense)
    xf = x.astype(f32).transpose(0, 2, 3, 1).reshape(n, h, w * cin)

    def full3(shape):
        return pl.BlockSpec(shape, lambda i: (0, 0, 0))

    def full2(shape):
        return pl.BlockSpec(shape, lambda i: (0, 0))

    out = pl.pallas_call(
        fused_up_kernel,
        grid=(1,),
        in_specs=[
            full3(xf.shape), full3(ah3.shape), full3(m1.shape),
            full3(p3.shape), full3(wb2.shape),
            full2(g1l.shape), full2(be1l.shape),
            full2(g2l.shape), full2(be2l.shape),
            full2(sel.shape),
        ],
        out_specs=full3((n, h2, w2 * cout)),
        out_shape=jax.ShapeDtypeStruct((n, h2, w2 * cout), f32),
        compiler_params=pltpu.CompilerParams(
            dimension_semantics=("arbitrary",)),
    )(xf, ah3, m1, p3, wb2, g1l, be1l, g2l, be2l, sel)

    return out.reshape(n, h2, w2, cout).transpose(0, 3, 1, 2)      # back to NCHW


# --------------------------- pure-JAX reference ------------------------------

def ref_forward(params, x):
    n, c, h, w = x.shape
    ah = bilinear_matrix(h, 2 * h)
    aw = bilinear_matrix(w, 2 * w)
    x = jnp.einsum("Hh,Ww,nchw->ncHW", ah, aw, x.astype(jnp.float32),
                   precision="highest")

    def conv_bn_relu(x, wgt, b, g, beta):
        y = jax.lax.conv_general_dilated(
            x, wgt, (1, 1), ((1, 1), (1, 1)),
            dimension_numbers=("NCHW", "OIHW", "NCHW"),
            precision=jax.lax.Precision.HIGHEST)
        y = y + b[None, :, None, None]            # bias kept here (cancelled by BN)
        mean = y.mean(axis=(0, 2, 3), keepdims=True)
        var = ((y - mean) ** 2).mean(axis=(0, 2, 3), keepdims=True)
        yn = (y - mean) / jnp.sqrt(var + EPS)
        return jnp.maximum(g[None, :, None, None] * yn
                           + beta[None, :, None, None], 0.0)

    x = conv_bn_relu(x, params["w1"], params["b1"], params["g1"], params["beta1"])
    x = conv_bn_relu(x, params["w2"], params["b2"], params["g2"], params["beta2"])
    return x


# ----------------------------------- main ------------------------------------

if __name__ == "__main__":
    in_ch, out_ch = 8, 4
    N, H, W = 2, 16, 16

    key = jax.random.PRNGKey(0)
    k = jax.random.split(key, 8)
    params = {
        "w1": 0.1 * jax.random.normal(k[0], (out_ch, in_ch, 3, 3), jnp.float32),
        "b1": 0.1 * jax.random.normal(k[1], (out_ch,), jnp.float32),
        "g1": 1.0 + 0.1 * jax.random.normal(k[2], (out_ch,), jnp.float32),
        "beta1": 0.1 * jax.random.normal(k[3], (out_ch,), jnp.float32),
        "w2": 0.1 * jax.random.normal(k[4], (out_ch, out_ch, 3, 3), jnp.float32),
        "b2": 0.1 * jax.random.normal(k[5], (out_ch,), jnp.float32),
        "g2": 1.0 + 0.1 * jax.random.normal(k[6], (out_ch,), jnp.float32),
        "beta2": 0.1 * jax.random.normal(k[7], (out_ch,), jnp.float32),
    }
    x = jax.random.normal(jax.random.PRNGKey(1), (N, in_ch, H, W), jnp.float32)

    out = jax.block_until_ready(up_forward(params, x))
    assert out.shape == (N, out_ch, 2 * H, 2 * W), out.shape

    ref = jax.block_until_ready(ref_forward(params, x))
    assert jnp.allclose(out, ref, atol=2e-3, rtol=2e-3), float(
        jnp.max(jnp.abs(out - ref)))

    print("KERNEL_OK")
</pallas_src>

<mosaic_0001>
module attributes {stable_mosaic.version = 11 : i64} {
  func.func @fused_up_kernel(%arg0: i32, %arg1: memref<2x16x128xf32, #tpu.memory_space<vmem>>, %arg2: memref<3x32x16xf32, #tpu.memory_space<vmem>>, %arg3: memref<3x128x128xf32, #tpu.memory_space<vmem>>, %arg4: memref<3x32x32xf32, #tpu.memory_space<vmem>>, %arg5: memref<3x128x128xf32, #tpu.memory_space<vmem>>, %arg6: memref<1x128xf32, #tpu.memory_space<vmem>>, %arg7: memref<1x128xf32, #tpu.memory_space<vmem>>, %arg8: memref<1x128xf32, #tpu.memory_space<vmem>>, %arg9: memref<1x128xf32, #tpu.memory_space<vmem>>, %arg10: memref<128x4xf32, #tpu.memory_space<vmem>>, %arg11: memref<2x32x128xf32, #tpu.memory_space<vmem>>) attributes {dimension_semantics = [#tpu.dimension_semantics<arbitrary>], iteration_bounds = array<i64: 1>, scalar_prefetch = 0 : i64, scratch_operands = 0 : i64, tpu.core_type = #tpu.core_type<tc>, window_params = [{pipeline_mode = #tpu.pipeline_mode<synchronous>, transform_indices = @transform_0, window_bounds = array<i64: 2, 16, 128>}, {pipeline_mode = #tpu.pipeline_mode<synchronous>, transform_indices = @transform_1, window_bounds = array<i64: 3, 32, 16>}, {pipeline_mode = #tpu.pipeline_mode<synchronous>, transform_indices = @transform_2, window_bounds = array<i64: 3, 128, 128>}, {pipeline_mode = #tpu.pipeline_mode<synchronous>, transform_indices = @transform_3, window_bounds = array<i64: 3, 32, 32>}, {pipeline_mode = #tpu.pipeline_mode<synchronous>, transform_indices = @transform_4, window_bounds = array<i64: 3, 128, 128>}, {pipeline_mode = #tpu.pipeline_mode<synchronous>, transform_indices = @transform_5, window_bounds = array<i64: 1, 128>}, {pipeline_mode = #tpu.pipeline_mode<synchronous>, transform_indices = @transform_6, window_bounds = array<i64: 1, 128>}, {pipeline_mode = #tpu.pipeline_mode<synchronous>, transform_indices = @transform_7, window_bounds = array<i64: 1, 128>}, {pipeline_mode = #tpu.pipeline_mode<synchronous>, transform_indices = @transform_8, window_bounds = array<i64: 1, 128>}, {pipeline_mode = #tpu.pipeline_mode<synchronous>, transform_indices = @transform_9, window_bounds = array<i64: 128, 4>}, {pipeline_mode = #tpu.pipeline_mode<synchronous>, transform_indices = @transform_10, window_bounds = array<i64: 2, 32, 128>}]} {
    %c0 = arith.constant 0 : index
    %c0_0 = arith.constant 0 : index
    %0 = vector.load %arg10[%c0, %c0_0] : memref<128x4xf32, #tpu.memory_space<vmem>>, vector<128x4xf32>
    %cst = arith.constant 0.000000e+00 : f32
    %1 = vector.broadcast %cst : f32 to vector<1x128xf32>
    %cst_1 = arith.constant 0.000000e+00 : f32
    %2 = vector.broadcast %cst_1 : f32 to vector<1x128xf32>
    %c0_2 = arith.constant 0 : index
    %c0_3 = arith.constant 0 : index
    %c0_4 = arith.constant 0 : index
    %3 = vector.load %arg1[%c0_2, %c0_3, %c0_4] : memref<2x16x128xf32, #tpu.memory_space<vmem>>, vector<1x16x128xf32>
    %4 = vector.shape_cast %3 : vector<1x16x128xf32> to vector<16x128xf32>
    %cst_5 = arith.constant 0.000000e+00 : f32
    %5 = vector.broadcast %cst_5 : f32 to vector<32x128xf32>
    %c0_6 = arith.constant 0 : index
    %c0_7 = arith.constant 0 : index
    %c0_8 = arith.constant 0 : index
    %6 = vector.load %arg2[%c0_6, %c0_7, %c0_8] : memref<3x32x16xf32, #tpu.memory_space<vmem>>, vector<1x32x16xf32>
    %7 = vector.shape_cast %6 : vector<1x32x16xf32> to vector<32x16xf32>
    %cst_9 = arith.constant dense<0.000000e+00> : vector<32x128xf32>
    %8 = tpu.matmul %7, %4, %cst_9 {dimension_numbers = #tpu.dot_dimension_numbers<[1], [0], [0], [1], [0, 0, 1, 1], [], []>} : vector<32x16xf32>, vector<16x128xf32>, vector<32x128xf32> -> vector<32x128xf32>
    %c0_10 = arith.constant 0 : index
    %c0_11 = arith.constant 0 : index
    %c0_12 = arith.constant 0 : index
    %9 = vector.load %arg3[%c0_10, %c0_11, %c0_12] : memref<3x128x128xf32, #tpu.memory_space<vmem>>, vector<1x128x128xf32>
    %10 = vector.shape_cast %9 : vector<1x128x128xf32> to vector<128x128xf32>
    %cst_13 = arith.constant dense<0.000000e+00> : vector<32x128xf32>
    %11 = tpu.matmul %8, %10, %cst_13 {dimension_numbers = #tpu.dot_dimension_numbers<[1], [0], [0], [1], [0, 0, 1, 1], [], []>} : vector<32x128xf32>, vector<128x128xf32>, vector<32x128xf32> -> vector<32x128xf32>
    %12 = arith.addf %5, %11 : vector<32x128xf32>
    %c1 = arith.constant 1 : index
    %c0_14 = arith.constant 0 : index
    %c0_15 = arith.constant 0 : index
    %13 = vector.load %arg2[%c1, %c0_14, %c0_15] : memref<3x32x16xf32, #tpu.memory_space<vmem>>, vector<1x32x16xf32>
    %14 = vector.shape_cast %13 : vector<1x32x16xf32> to vector<32x16xf32>
    %cst_16 = arith.constant dense<0.000000e+00> : vector<32x128xf32>
    %15 = tpu.matmul %14, %4, %cst_16 {dimension_numbers = #tpu.dot_dimension_numbers<[1], [0], [0], [1], [0, 0, 1, 1], [], []>} : vector<32x16xf32>, vector<16x128xf32>, vector<32x128xf32> -> vector<32x128xf32>
    %c1_17 = arith.constant 1 : index
    %c0_18 = arith.constant 0 : index
    %c0_19 = arith.constant 0 : index
    %16 = vector.load %arg3[%c1_17, %c0_18, %c0_19] : memref<3x128x128xf32, #tpu.memory_space<vmem>>, vector<1x128x128xf32>
    %17 = vector.shape_cast %16 : vector<1x128x128xf32> to vector<128x128xf32>
    %cst_20 = arith.constant dense<0.000000e+00> : vector<32x128xf32>
    %18 = tpu.matmul %15, %17, %cst_20 {dimension_numbers = #tpu.dot_dimension_numbers<[1], [0], [0], [1], [0, 0, 1, 1], [], []>} : vector<32x128xf32>, vector<128x128xf32>, vector<32x128xf32> -> vector<32x128xf32>
    %19 = arith.addf %12, %18 : vector<32x128xf32>
    %c2 = arith.constant 2 : index
    %c0_21 = arith.constant 0 : index
    %c0_22 = arith.constant 0 : index
    %20 = vector.load %arg2[%c2, %c0_21, %c0_22] : memref<3x32x16xf32, #tpu.memory_space<vmem>>, vector<1x32x16xf32>
    %21 = vector.shape_cast %20 : vector<1x32x16xf32> to vector<32x16xf32>
    %cst_23 = arith.constant dense<0.000000e+00> : vector<32x128xf32>
    %22 = tpu.matmul %21, %4, %cst_23 {dimension_numbers = #tpu.dot_dimension_numbers<[1], [0], [0], [1], [0, 0, 1, 1], [], []>} : vector<32x16xf32>, vector<16x128xf32>, vector<32x128xf32> -> vector<32x128xf32>
    %c2_24 = arith.constant 2 : index
    %c0_25 = arith.constant 0 : index
    %c0_26 = arith.constant 0 : index
    %23 = vector.load %arg3[%c2_24, %c0_25, %c0_26] : memref<3x128x128xf32, #tpu.memory_space<vmem>>, vector<1x128x128xf32>
    %24 = vector.shape_cast %23 : vector<1x128x128xf32> to vector<128x128xf32>
    %cst_27 = arith.constant dense<0.000000e+00> : vector<32x128xf32>
    %25 = tpu.matmul %22, %24, %cst_27 {dimension_numbers = #tpu.dot_dimension_numbers<[1], [0], [0], [1], [0, 0, 1, 1], [], []>} : vector<32x128xf32>, vector<128x128xf32>, vector<32x128xf32> -> vector<32x128xf32>
    %26 = arith.addf %19, %25 : vector<32x128xf32>
    %cst_28 = arith.constant dense<0.000000e+00> : vector<128xf32>
    %27 = vector.multi_reduction <add>, %26, %cst_28 [0] : vector<32x128xf32> to vector<128xf32>
    %28 = vector.shape_cast %27 : vector<128xf32> to vector<1x128xf32>
    %29 = arith.addf %1, %28 : vector<1x128xf32>
    %30 = arith.mulf %26, %26 : vector<32x128xf32>
    %cst_29 = arith.constant dense<0.000000e+00> : vector<128xf32>
    %31 = vector.multi_reduction <add>, %30, %cst_29 [0] : vector<32x128xf32> to vector<128xf32>
    %32 = vector.shape_cast %31 : vector<128xf32> to vector<1x128xf32>
    %33 = arith.addf %2, %32 : vector<1x128xf32>
    %c1_30 = arith.constant 1 : index
    %c0_31 = arith.constant 0 : index
    %c0_32 = arith.constant 0 : index
    %34 = vector.load %arg1[%c1_30, %c0_31, %c0_32] : memref<2x16x128xf32, #tpu.memory_space<vmem>>, vector<1x16x128xf32>
    %35 = vector.shape_cast %34 : vector<1x16x128xf32> to vector<16x128xf32>
    %cst_33 = arith.constant 0.000000e+00 : f32
    %36 = vector.broadcast %cst_33 : f32 to vector<32x128xf32>
    %c0_34 = arith.constant 0 : index
    %c0_35 = arith.constant 0 : index
    %c0_36 = arith.constant 0 : index
    %37 = vector.load %arg2[%c0_34, %c0_35, %c0_36] : memref<3x32x16xf32, #tpu.memory_space<vmem>>, vector<1x32x16xf32>
    %38 = vector.shape_cast %37 : vector<1x32x16xf32> to vector<32x16xf32>
    %cst_37 = arith.constant dense<0.000000e+00> : vector<32x128xf32>
    %39 = tpu.matmul %38, %35, %cst_37 {dimension_numbers = #tpu.dot_dimension_numbers<[1], [0], [0], [1], [0, 0, 1, 1], [], []>} : vector<32x16xf32>, vector<16x128xf32>, vector<32x128xf32> -> vector<32x128xf32>
    %c0_38 = arith.constant 0 : index
    %c0_39 = arith.constant 0 : index
    %c0_40 = arith.constant 0 : index
    %40 = vector.load %arg3[%c0_38, %c0_39, %c0_40] : memref<3x128x128xf32, #tpu.memory_space<vmem>>, vector<1x128x128xf32>
    %41 = vector.shape_cast %40 : vector<1x128x128xf32> to vector<128x128xf32>
    %cst_41 = arith.constant dense<0.000000e+00> : vector<32x128xf32>
    %42 = tpu.matmul %39, %41, %cst_41 {dimension_numbers = #tpu.dot_dimension_numbers<[1], [0], [0], [1], [0, 0, 1, 1], [], []>} : vector<32x128xf32>, vector<128x128xf32>, vector<32x128xf32> -> vector<32x128xf32>
    %43 = arith.addf %36, %42 : vector<32x128xf32>
    %c1_42 = arith.constant 1 : index
    %c0_43 = arith.constant 0 : index
    %c0_44 = arith.constant 0 : index
    %44 = vector.load %arg2[%c1_42, %c0_43, %c0_44] : memref<3x32x16xf32, #tpu.memory_space<vmem>>, vector<1x32x16xf32>
    %45 = vector.shape_cast %44 : vector<1x32x16xf32> to vector<32x16xf32>
    %cst_45 = arith.constant dense<0.000000e+00> : vector<32x128xf32>
    %46 = tpu.matmul %45, %35, %cst_45 {dimension_numbers = #tpu.dot_dimension_numbers<[1], [0], [0], [1], [0, 0, 1, 1], [], []>} : vector<32x16xf32>, vector<16x128xf32>, vector<32x128xf32> -> vector<32x128xf32>
    %c1_46 = arith.constant 1 : index
    %c0_47 = arith.constant 0 : index
    %c0_48 = arith.constant 0 : index
    %47 = vector.load %arg3[%c1_46, %c0_47, %c0_48] : memref<3x128x128xf32, #tpu.memory_space<vmem>>, vector<1x128x128xf32>
    %48 = vector.shape_cast %47 : vector<1x128x128xf32> to vector<128x128xf32>
    %cst_49 = arith.constant dense<0.000000e+00> : vector<32x128xf32>
    %49 = tpu.matmul %46, %48, %cst_49 {dimension_numbers = #tpu.dot_dimension_numbers<[1], [0], [0], [1], [0, 0, 1, 1], [], []>} : vector<32x128xf32>, vector<128x128xf32>, vector<32x128xf32> -> vector<32x128xf32>
    %50 = arith.addf %43, %49 : vector<32x128xf32>
    %c2_50 = arith.constant 2 : index
    %c0_51 = arith.constant 0 : index
    %c0_52 = arith.constant 0 : index
    %51 = vector.load %arg2[%c2_50, %c0_51, %c0_52] : memref<3x32x16xf32, #tpu.memory_space<vmem>>, vector<1x32x16xf32>
    %52 = vector.shape_cast %51 : vector<1x32x16xf32> to vector<32x16xf32>
    %cst_53 = arith.constant dense<0.000000e+00> : vector<32x128xf32>
    %53 = tpu.matmul %52, %35, %cst_53 {dimension_numbers = #tpu.dot_dimension_numbers<[1], [0], [0], [1], [0, 0, 1, 1], [], []>} : vector<32x16xf32>, vector<16x128xf32>, vector<32x128xf32> -> vector<32x128xf32>
    %c2_54 = arith.constant 2 : index
    %c0_55 = arith.constant 0 : index
    %c0_56 = arith.constant 0 : index
    %54 = vector.load %arg3[%c2_54, %c0_55, %c0_56] : memref<3x128x128xf32, #tpu.memory_space<vmem>>, vector<1x128x128xf32>
    %55 = vector.shape_cast %54 : vector<1x128x128xf32> to vector<128x128xf32>
    %cst_57 = arith.constant dense<0.000000e+00> : vector<32x128xf32>
    %56 = tpu.matmul %53, %55, %cst_57 {dimension_numbers = #tpu.dot_dimension_numbers<[1], [0], [0], [1], [0, 0, 1, 1], [], []>} : vector<32x128xf32>, vector<128x128xf32>, vector<32x128xf32> -> vector<32x128xf32>
    %57 = arith.addf %50, %56 : vector<32x128xf32>
    %cst_58 = arith.constant dense<0.000000e+00> : vector<128xf32>
    %58 = vector.multi_reduction <add>, %57, %cst_58 [0] : vector<32x128xf32> to vector<128xf32>
    %59 = vector.shape_cast %58 : vector<128xf32> to vector<1x128xf32>
    %60 = arith.addf %29, %59 : vector<1x128xf32>
    %61 = arith.mulf %57, %57 : vector<32x128xf32>
    %cst_59 = arith.constant dense<0.000000e+00> : vector<128xf32>
    %62 = vector.multi_reduction <add>, %61, %cst_59 [0] : vector<32x128xf32> to vector<128xf32>
    %63 = vector.shape_cast %62 : vector<128xf32> to vector<1x128xf32>
    %64 = arith.addf %33, %63 : vector<1x128xf32>
    %c0_60 = arith.constant 0 : index
    %c0_61 = arith.constant 0 : index
    %65 = vector.load %arg6[%c0_60, %c0_61] : memref<1x128xf32, #tpu.memory_space<vmem>>, vector<1x128xf32>
    %c0_62 = arith.constant 0 : index
    %c0_63 = arith.constant 0 : index
    %66 = vector.load %arg7[%c0_62, %c0_63] : memref<1x128xf32, #tpu.memory_space<vmem>>, vector<1x128xf32>
    %cst_64 = arith.constant dense<0.000000e+00> : vector<1x4xf32>
    %67 = tpu.matmul %60, %0, %cst_64 {dimension_numbers = #tpu.dot_dimension_numbers<[1], [0], [0], [1], [0, 0, 1, 1], [], []>} : vector<1x128xf32>, vector<128x4xf32>, vector<1x4xf32> -> vector<1x4xf32>
    %cst_65 = arith.constant dense<0.000000e+00> : vector<1x4xf32>
    %68 = tpu.matmul %64, %0, %cst_65 {dimension_numbers = #tpu.dot_dimension_numbers<[1], [0], [0], [1], [0, 0, 1, 1], [], []>} : vector<1x128xf32>, vector<128x4xf32>, vector<1x4xf32> -> vector<1x4xf32>
    %cst_66 = arith.constant 4.8828125E-4 : f32
    %69 = vector.broadcast %cst_66 : f32 to vector<1x4xf32>
    %70 = arith.mulf %67, %69 : vector<1x4xf32>
    %cst_67 = arith.constant 4.8828125E-4 : f32
    %71 = vector.broadcast %cst_67 : f32 to vector<1x4xf32>
    %72 = arith.mulf %68, %71 : vector<1x4xf32>
    %73 = arith.mulf %70, %70 : vector<1x4xf32>
    %74 = arith.subf %72, %73 : vector<1x4xf32>
    %cst_68 = arith.constant 9.99999974E-6 : f32
    %75 = vector.broadcast %cst_68 : f32 to vector<1x4xf32>
    %76 = arith.addf %74, %75 : vector<1x4xf32>
    %77 = math.rsqrt %76 : vector<1x4xf32>
    %cst_69 = arith.constant dense<0.000000e+00> : vector<1x128xf32>
    %78 = tpu.matmul %70, %0, %cst_69 {dimension_numbers = #tpu.dot_dimension_numbers<[1], [1], [0], [0], [0, 0, 1, 0], [], []>} : vector<1x4xf32>, vector<128x4xf32>, vector<1x128xf32> -> vector<1x128xf32>
    %cst_70 = arith.constant dense<0.000000e+00> : vector<1x128xf32>
    %79 = tpu.matmul %77, %0, %cst_70 {dimension_numbers = #tpu.dot_dimension_numbers<[1], [1], [0], [0], [0, 0, 1, 0], [], []>} : vector<1x4xf32>, vector<128x4xf32>, vector<1x128xf32> -> vector<1x128xf32>
    %80 = arith.mulf %65, %79 : vector<1x128xf32>
    %81 = arith.mulf %78, %80 : vector<1x128xf32>
    %82 = arith.subf %66, %81 : vector<1x128xf32>
    %cst_71 = arith.constant 0.000000e+00 : f32
    %83 = vector.broadcast %cst_71 : f32 to vector<1x128xf32>
    %cst_72 = arith.constant 0.000000e+00 : f32
    %84 = vector.broadcast %cst_72 : f32 to vector<1x128xf32>
    %85 = vector.broadcast %80 : vector<1x128xf32> to vector<32x128xf32>
    %86 = arith.mulf %26, %85 : vector<32x128xf32>
    %87 = vector.broadcast %82 : vector<1x128xf32> to vector<32x128xf32>
    %88 = arith.addf %86, %87 : vector<32x128xf32>
    %cst_73 = arith.constant 0.000000e+00 : f32
    %89 = vector.broadcast %cst_73 : f32 to vector<32x128xf32>
    %90 = arith.maximumf %88, %89 : vector<32x128xf32>
    %cst_74 = arith.constant 0.000000e+00 : f32
    %91 = vector.broadcast %cst_74 : f32 to vector<32x128xf32>
    %c0_75 = arith.constant 0 : index
    %c0_76 = arith.constant 0 : index
    %c0_77 = arith.constant 0 : index
    %92 = vector.load %arg4[%c0_75, %c0_76, %c0_77] : memref<3x32x32xf32, #tpu.memory_space<vmem>>, vector<1x32x32xf32>
    %93 = vector.shape_cast %92 : vector<1x32x32xf32> to vector<32x32xf32>
    %cst_78 = arith.constant dense<0.000000e+00> : vector<32x128xf32>
    %94 = tpu.matmul %93, %90, %cst_78 {dimension_numbers = #tpu.dot_dimension_numbers<[1], [0], [0], [1], [0, 0, 1, 1], [], []>} : vector<32x32xf32>, vector<32x128xf32>, vector<32x128xf32> -> vector<32x128xf32>
    %c0_79 = arith.constant 0 : index
    %c0_80 = arith.constant 0 : index
    %c0_81 = arith.constant 0 : index
    %95 = vector.load %arg5[%c0_79, %c0_80, %c0_81] : memref<3x128x128xf32, #tpu.memory_space<vmem>>, vector<1x128x128xf32>
    %96 = vector.shape_cast %95 : vector<1x128x128xf32> to vector<128x128xf32>
    %cst_82 = arith.constant dense<0.000000e+00> : vector<32x128xf32>
    %97 = tpu.matmul %94, %96, %cst_82 {dimension_numbers = #tpu.dot_dimension_numbers<[1], [0], [0], [1], [0, 0, 1, 1], [], []>} : vector<32x128xf32>, vector<128x128xf32>, vector<32x128xf32> -> vector<32x128xf32>
    %98 = arith.addf %91, %97 : vector<32x128xf32>
    %c1_83 = arith.constant 1 : index
    %c0_84 = arith.constant 0 : index
    %c0_85 = arith.constant 0 : index
    %99 = vector.load %arg4[%c1_83, %c0_84, %c0_85] : memref<3x32x32xf32, #tpu.memory_space<vmem>>, vector<1x32x32xf32>
    %100 = vector.shape_cast %99 : vector<1x32x32xf32> to vector<32x32xf32>
    %cst_86 = arith.constant dense<0.000000e+00> : vector<32x128xf32>
    %101 = tpu.matmul %100, %90, %cst_86 {dimension_numbers = #tpu.dot_dimension_numbers<[1], [0], [0], [1], [0, 0, 1, 1], [], []>} : vector<32x32xf32>, vector<32x128xf32>, vector<32x128xf32> -> vector<32x128xf32>
    %c1_87 = arith.constant 1 : index
    %c0_88 = arith.constant 0 : index
    %c0_89 = arith.constant 0 : index
    %102 = vector.load %arg5[%c1_87, %c0_88, %c0_89] : memref<3x128x128xf32, #tpu.memory_space<vmem>>, vector<1x128x128xf32>
    %103 = vector.shape_cast %102 : vector<1x128x128xf32> to vector<128x128xf32>
    %cst_90 = arith.constant dense<0.000000e+00> : vector<32x128xf32>
    %104 = tpu.matmul %101, %103, %cst_90 {dimension_numbers = #tpu.dot_dimension_numbers<[1], [0], [0], [1], [0, 0, 1, 1], [], []>} : vector<32x128xf32>, vector<128x128xf32>, vector<32x128xf32> -> vector<32x128xf32>
    %105 = arith.addf %98, %104 : vector<32x128xf32>
    %c2_91 = arith.constant 2 : index
    %c0_92 = arith.constant 0 : index
    %c0_93 = arith.constant 0 : index
    %106 = vector.load %arg4[%c2_91, %c0_92, %c0_93] : memref<3x32x32xf32, #tpu.memory_space<vmem>>, vector<1x32x32xf32>
    %107 = vector.shape_cast %106 : vector<1x32x32xf32> to vector<32x32xf32>
    %cst_94 = arith.constant dense<0.000000e+00> : vector<32x128xf32>
    %108 = tpu.matmul %107, %90, %cst_94 {dimension_numbers = #tpu.dot_dimension_numbers<[1], [0], [0], [1], [0, 0, 1, 1], [], []>} : vector<32x32xf32>, vector<32x128xf32>, vector<32x128xf32> -> vector<32x128xf32>
    %c2_95 = arith.constant 2 : index
    %c0_96 = arith.constant 0 : index
    %c0_97 = arith.constant 0 : index
    %109 = vector.load %arg5[%c2_95, %c0_96, %c0_97] : memref<3x128x128xf32, #tpu.memory_space<vmem>>, vector<1x128x128xf32>
    %110 = vector.shape_cast %109 : vector<1x128x128xf32> to vector<128x128xf32>
    %cst_98 = arith.constant dense<0.000000e+00> : vector<32x128xf32>
    %111 = tpu.matmul %108, %110, %cst_98 {dimension_numbers = #tpu.dot_dimension_numbers<[1], [0], [0], [1], [0, 0, 1, 1], [], []>} : vector<32x128xf32>, vector<128x128xf32>, vector<32x128xf32> -> vector<32x128xf32>
    %112 = arith.addf %105, %111 : vector<32x128xf32>
    %cst_99 = arith.constant dense<0.000000e+00> : vector<128xf32>
    %113 = vector.multi_reduction <add>, %112, %cst_99 [0] : vector<32x128xf32> to vector<128xf32>
    %114 = vector.shape_cast %113 : vector<128xf32> to vector<1x128xf32>
    %115 = arith.addf %83, %114 : vector<1x128xf32>
    %116 = arith.mulf %112, %112 : vector<32x128xf32>
    %cst_100 = arith.constant dense<0.000000e+00> : vector<128xf32>
    %117 = vector.multi_reduction <add>, %116, %cst_100 [0] : vector<32x128xf32> to vector<128xf32>
    %118 = vector.shape_cast %117 : vector<128xf32> to vector<1x128xf32>
    %119 = arith.addf %84, %118 : vector<1x128xf32>
    %120 = vector.broadcast %80 : vector<1x128xf32> to vector<32x128xf32>
    %121 = arith.mulf %57, %120 : vector<32x128xf32>
    %122 = vector.broadcast %82 : vector<1x128xf32> to vector<32x128xf32>
    %123 = arith.addf %121, %122 : vector<32x128xf32>
    %cst_101 = arith.constant 0.000000e+00 : f32
    %124 = vector.broadcast %cst_101 : f32 to vector<32x128xf32>
    %125 = arith.maximumf %123, %124 : vector<32x128xf32>
    %cst_102 = arith.constant 0.000000e+00 : f32
    %126 = vector.broadcast %cst_102 : f32 to vector<32x128xf32>
    %c0_103 = arith.constant 0 : index
    %c0_104 = arith.constant 0 : index
    %c0_105 = arith.constant 0 : index
    %127 = vector.load %arg4[%c0_103, %c0_104, %c0_105] : memref<3x32x32xf32, #tpu.memory_space<vmem>>, vector<1x32x32xf32>
    %128 = vector.shape_cast %127 : vector<1x32x32xf32> to vector<32x32xf32>
    %cst_106 = arith.constant dense<0.000000e+00> : vector<32x128xf32>
    %129 = tpu.matmul %128, %125, %cst_106 {dimension_numbers = #tpu.dot_dimension_numbers<[1], [0], [0], [1], [0, 0, 1, 1], [], []>} : vector<32x32xf32>, vector<32x128xf32>, vector<32x128xf32> -> vector<32x128xf32>
    %c0_107 = arith.constant 0 : index
    %c0_108 = arith.constant 0 : index
    %c0_109 = arith.constant 0 : index
    %130 = vector.load %arg5[%c0_107, %c0_108, %c0_109] : memref<3x128x128xf32, #tpu.memory_space<vmem>>, vector<1x128x128xf32>
    %131 = vector.shape_cast %130 : vector<1x128x128xf32> to vector<128x128xf32>
    %cst_110 = arith.constant dense<0.000000e+00> : vector<32x128xf32>
    %132 = tpu.matmul %129, %131, %cst_110 {dimension_numbers = #tpu.dot_dimension_numbers<[1], [0], [0], [1], [0, 0, 1, 1], [], []>} : vector<32x128xf32>, vector<128x128xf32>, vector<32x128xf32> -> vector<32x128xf32>
    %133 = arith.addf %126, %132 : vector<32x128xf32>
    %c1_111 = arith.constant 1 : index
    %c0_112 = arith.constant 0 : index
    %c0_113 = arith.constant 0 : index
    %134 = vector.load %arg4[%c1_111, %c0_112, %c0_113] : memref<3x32x32xf32, #tpu.memory_space<vmem>>, vector<1x32x32xf32>
    %135 = vector.shape_cast %134 : vector<1x32x32xf32> to vector<32x32xf32>
    %cst_114 = arith.constant dense<0.000000e+00> : vector<32x128xf32>
    %136 = tpu.matmul %135, %125, %cst_114 {dimension_numbers = #tpu.dot_dimension_numbers<[1], [0], [0], [1], [0, 0, 1, 1], [], []>} : vector<32x32xf32>, vector<32x128xf32>, vector<32x128xf32> -> vector<32x128xf32>
    %c1_115 = arith.constant 1 : index
    %c0_116 = arith.constant 0 : index
    %c0_117 = arith.constant 0 : index
    %137 = vector.load %arg5[%c1_115, %c0_116, %c0_117] : memref<3x128x128xf32, #tpu.memory_space<vmem>>, vector<1x128x128xf32>
    %138 = vector.shape_cast %137 : vector<1x128x128xf32> to vector<128x128xf32>
    %cst_118 = arith.constant dense<0.000000e+00> : vector<32x128xf32>
    %139 = tpu.matmul %136, %138, %cst_118 {dimension_numbers = #tpu.dot_dimension_numbers<[1], [0], [0], [1], [0, 0, 1, 1], [], []>} : vector<32x128xf32>, vector<128x128xf32>, vector<32x128xf32> -> vector<32x128xf32>
    %140 = arith.addf %133, %139 : vector<32x128xf32>
    %c2_119 = arith.constant 2 : index
    %c0_120 = arith.constant 0 : index
    %c0_121 = arith.constant 0 : index
    %141 = vector.load %arg4[%c2_119, %c0_120, %c0_121] : memref<3x32x32xf32, #tpu.memory_space<vmem>>, vector<1x32x32xf32>
    %142 = vector.shape_cast %141 : vector<1x32x32xf32> to vector<32x32xf32>
    %cst_122 = arith.constant dense<0.000000e+00> : vector<32x128xf32>
    %143 = tpu.matmul %142, %125, %cst_122 {dimension_numbers = #tpu.dot_dimension_numbers<[1], [0], [0], [1], [0, 0, 1, 1], [], []>} : vector<32x32xf32>, vector<32x128xf32>, vector<32x128xf32> -> vector<32x128xf32>
    %c2_123 = arith.constant 2 : index
    %c0_124 = arith.constant 0 : index
    %c0_125 = arith.constant 0 : index
    %144 = vector.load %arg5[%c2_123, %c0_124, %c0_125] : memref<3x128x128xf32, #tpu.memory_space<vmem>>, vector<1x128x128xf32>
    %145 = vector.shape_cast %144 : vector<1x128x128xf32> to vector<128x128xf32>
    %cst_126 = arith.constant dense<0.000000e+00> : vector<32x128xf32>
    %146 = tpu.matmul %143, %145, %cst_126 {dimension_numbers = #tpu.dot_dimension_numbers<[1], [0], [0], [1], [0, 0, 1, 1], [], []>} : vector<32x128xf32>, vector<128x128xf32>, vector<32x128xf32> -> vector<32x128xf32>
    %147 = arith.addf %140, %146 : vector<32x128xf32>
    %cst_127 = arith.constant dense<0.000000e+00> : vector<128xf32>
    %148 = vector.multi_reduction <add>, %147, %cst_127 [0] : vector<32x128xf32> to vector<128xf32>
    %149 = vector.shape_cast %148 : vector<128xf32> to vector<1x128xf32>
    %150 = arith.addf %115, %149 : vector<1x128xf32>
    %151 = arith.mulf %147, %147 : vector<32x128xf32>
    %cst_128 = arith.constant dense<0.000000e+00> : vector<128xf32>
    %152 = vector.multi_reduction <add>, %151, %cst_128 [0] : vector<32x128xf32> to vector<128xf32>
    %153 = vector.shape_cast %152 : vector<128xf32> to vector<1x128xf32>
    %154 = arith.addf %119, %153 : vector<1x128xf32>
    %c0_129 = arith.constant 0 : index
    %c0_130 = arith.constant 0 : index
    %155 = vector.load %arg8[%c0_129, %c0_130] : memref<1x128xf32, #tpu.memory_space<vmem>>, vector<1x128xf32>
    %c0_131 = arith.constant 0 : index
    %c0_132 = arith.constant 0 : index
    %156 = vector.load %arg9[%c0_131, %c0_132] : memref<1x128xf32, #tpu.memory_space<vmem>>, vector<1x128xf32>
    %cst_133 = arith.constant dense<0.000000e+00> : vector<1x4xf32>
    %157 = tpu.matmul %150, %0, %cst_133 {dimension_numbers = #tpu.dot_dimension_numbers<[1], [0], [0], [1], [0, 0, 1, 1], [], []>} : vector<1x128xf32>, vector<128x4xf32>, vector<1x4xf32> -> vector<1x4xf32>
    %cst_134 = arith.constant dense<0.000000e+00> : vector<1x4xf32>
    %158 = tpu.matmul %154, %0, %cst_134 {dimension_numbers = #tpu.dot_dimension_numbers<[1], [0], [0], [1], [0, 0, 1, 1], [], []>} : vector<1x128xf32>, vector<128x4xf32>, vector<1x4xf32> -> vector<1x4xf32>
    %cst_135 = arith.constant 4.8828125E-4 : f32
    %159 = vector.broadcast %cst_135 : f32 to vector<1x4xf32>
    %160 = arith.mulf %157, %159 : vector<1x4xf32>
    %cst_136 = arith.constant 4.8828125E-4 : f32
    %161 = vector.broadcast %cst_136 : f32 to vector<1x4xf32>
    %162 = arith.mulf %158, %161 : vector<1x4xf32>
    %163 = arith.mulf %160, %160 : vector<1x4xf32>
    %164 = arith.subf %162, %163 : vector<1x4xf32>
    %cst_137 = arith.constant 9.99999974E-6 : f32
    %165 = vector.broadcast %cst_137 : f32 to vector<1x4xf32>
    %166 = arith.addf %164, %165 : vector<1x4xf32>
    %167 = math.rsqrt %166 : vector<1x4xf32>
    %cst_138 = arith.constant dense<0.000000e+00> : vector<1x128xf32>
    %168 = tpu.matmul %160, %0, %cst_138 {dimension_numbers = #tpu.dot_dimension_numbers<[1], [1], [0], [0], [0, 0, 1, 0], [], []>} : vector<1x4xf32>, vector<128x4xf32>, vector<1x128xf32> -> vector<1x128xf32>
    %cst_139 = arith.constant dense<0.000000e+00> : vector<1x128xf32>
    %169 = tpu.matmul %167, %0, %cst_139 {dimension_numbers = #tpu.dot_dimension_numbers<[1], [1], [0], [0], [0, 0, 1, 0], [], []>} : vector<1x4xf32>, vector<128x4xf32>, vector<1x128xf32> -> vector<1x128xf32>
    %170 = arith.mulf %155, %169 : vector<1x128xf32>
    %171 = arith.mulf %168, %170 : vector<1x128xf32>
    %172 = arith.subf %156, %171 : vector<1x128xf32>
    %173 = vector.broadcast %170 : vector<1x128xf32> to vector<32x128xf32>
    %174 = arith.mulf %112, %173 : vector<32x128xf32>
    %175 = vector.broadcast %172 : vector<1x128xf32> to vector<32x128xf32>
    %176 = arith.addf %174, %175 : vector<32x128xf32>
    %cst_140 = arith.constant 0.000000e+00 : f32
    %177 = vector.broadcast %cst_140 : f32 to vector<32x128xf32>
    %178 = arith.maximumf %176, %177 : vector<32x128xf32>
    %c0_141 = arith.constant 0 : index
    %c0_142 = arith.constant 0 : index
    %c0_143 = arith.constant 0 : index
    %179 = vector.load %arg11[%c0_141, %c0_142, %c0_143] : memref<2x32x128xf32, #tpu.memory_space<vmem>>, vector<1x32x128xf32>
    %180 = vector.shape_cast %179 : vector<1x32x128xf32> to vector<32x128xf32>
    %181 = vector.shape_cast %178 : vector<32x128xf32> to vector<1x32x128xf32>
    tpu.vector_store %arg11[%c0_141, %c0_142, %c0_143], %181 {strides = array<i32>} : memref<2x32x128xf32, #tpu.memory_space<vmem>>, vector<1x32x128xf32>,
    %182 = vector.broadcast %170 : vector<1x128xf32> to vector<32x128xf32>
    %183 = arith.mulf %147, %182 : vector<32x128xf32>
    %184 = vector.broadcast %172 : vector<1x128xf32> to vector<32x128xf32>
    %185 = arith.addf %183, %184 : vector<32x128xf32>
    %cst_144 = arith.constant 0.000000e+00 : f32
    %186 = vector.broadcast %cst_144 : f32 to vector<32x128xf32>
    %187 = arith.maximumf %185, %186 : vector<32x128xf32>
    %c1_145 = arith.constant 1 : index
    %c0_146 = arith.constant 0 : index
    %c0_147 = arith.constant 0 : index
    %188 = vector.load %arg11[%c1_145, %c0_146, %c0_147] : memref<2x32x128xf32, #tpu.memory_space<vmem>>, vector<1x32x128xf32>
    %189 = vector.shape_cast %188 : vector<1x32x128xf32> to vector<32x128xf32>
    %190 = vector.shape_cast %187 : vector<32x128xf32> to vector<1x32x128xf32>
    tpu.vector_store %arg11[%c1_145, %c0_146, %c0_147], %190 {strides = array<i32>} : memref<2x32x128xf32, #tpu.memory_space<vmem>>, vector<1x32x128xf32>,
    return
  }
  func.func @transform_0(%arg0: i32) -> (i32, i32, i32) {
    %c0_i32 = arith.constant 0 : i32
    %c0_i32_0 = arith.constant 0 : i32
    %c0_i32_1 = arith.constant 0 : i32
    %c0_i32_2 = arith.constant 0 : i32
    return %c0_i32, %c0_i32_0, %c0_i32_1 : i32, i32, i32
  }
  func.func @transform_1(%arg0: i32) -> (i32, i32, i32) {
    %c0_i32 = arith.constant 0 : i32
    %c0_i32_0 = arith.constant 0 : i32
    %c0_i32_1 = arith.constant 0 : i32
    %c0_i32_2 = arith.constant 0 : i32
    return %c0_i32, %c0_i32_0, %c0_i32_1 : i32, i32, i32
  }
  func.func @transform_2(%arg0: i32) -> (i32, i32, i32) {
    %c0_i32 = arith.constant 0 : i32
    %c0_i32_0 = arith.constant 0 : i32
    %c0_i32_1 = arith.constant 0 : i32
    %c0_i32_2 = arith.constant 0 : i32
    return %c0_i32, %c0_i32_0, %c0_i32_1 : i32, i32, i32
  }
  func.func @transform_3(%arg0: i32) -> (i32, i32, i32) {
    %c0_i32 = arith.constant 0 : i32
    %c0_i32_0 = arith.constant 0 : i32
    %c0_i32_1 = arith.constant 0 : i32
    %c0_i32_2 = arith.constant 0 : i32
    return %c0_i32, %c0_i32_0, %c0_i32_1 : i32, i32, i32
  }
  func.func @transform_4(%arg0: i32) -> (i32, i32, i32) {
    %c0_i32 = arith.constant 0 : i32
    %c0_i32_0 = arith.constant 0 : i32
    %c0_i32_1 = arith.constant 0 : i32
    %c0_i32_2 = arith.constant 0 : i32
    return %c0_i32, %c0_i32_0, %c0_i32_1 : i32, i32, i32
  }
  func.func @transform_5(%arg0: i32) -> (i32, i32) {
    %c0_i32 = arith.constant 0 : i32
    %c0_i32_0 = arith.constant 0 : i32
    %c0_i32_1 = arith.constant 0 : i32
    return %c0_i32, %c0_i32_0 : i32, i32
  }
  func.func @transform_6(%arg0: i32) -> (i32, i32) {
    %c0_i32 = arith.constant 0 : i32
    %c0_i32_0 = arith.constant 0 : i32
    %c0_i32_1 = arith.constant 0 : i32
    return %c0_i32, %c0_i32_0 : i32, i32
  }
  func.func @transform_7(%arg0: i32) -> (i32, i32) {
    %c0_i32 = arith.constant 0 : i32
    %c0_i32_0 = arith.constant 0 : i32
    %c0_i32_1 = arith.constant 0 : i32
    return %c0_i32, %c0_i32_0 : i32, i32
  }
  func.func @transform_8(%arg0: i32) -> (i32, i32) {
    %c0_i32 = arith.constant 0 : i32
    %c0_i32_0 = arith.constant 0 : i32
    %c0_i32_1 = arith.constant 0 : i32
    return %c0_i32, %c0_i32_0 : i32, i32
  }
  func.func @transform_9(%arg0: i32) -> (i32, i32) {
    %c0_i32 = arith.constant 0 : i32
    %c0_i32_0 = arith.constant 0 : i32
    %c0_i32_1 = arith.constant 0 : i32
    return %c0_i32, %c0_i32_0 : i32, i32
  }
  func.func @transform_10(%arg0: i32) -> (i32, i32, i32) {
    %c0_i32 = arith.constant 0 : i32
    %c0_i32_0 = arith.constant 0 : i32
    %c0_i32_1 = arith.constant 0 : i32
    %c0_i32_2 = arith.constant 0 : i32
    return %c0_i32, %c0_i32_0, %c0_i32_1 : i32, i32, i32
  }
}

</mosaic_0001>

<bundles_post_ra>
// kernel: tpu_custom_call.1
= control target key start
LH: loop header
LB: loop body
LE: loop exit
PB: predicated region body
PF: predicated region fallthrough
CT: control target
= control target key end

     0   :  { %15 = vsyncpa [#allocation3], 0  ;;  %s2544_s0 = inlined_call_operand.vmem [shape: f32[2,16,128], index: 0, kind: input, shape index: {}]   ;;  %s2545_s1 = inlined_call_operand.vmem [shape: f32[3,32,16], index: 1, kind: input, shape index: {}]   ;;  %s2546_s2 = inlined_call_operand.hbm [shape: f32[3,128,128], index: 2, kind: input, shape index: {}]   ;;  %s2547_s3 = inlined_call_operand.vmem [shape: f32[3,32,32], index: 3, kind: input, shape index: {}]   ;;  %s2548_s4 = inlined_call_operand.hbm [shape: f32[3,128,128], index: 4, kind: input, shape index: {}]   ;;  %s2549_s5 = inlined_call_operand.vmem [shape: f32[1,128], index: 5, kind: input, shape index: {}]   ;;  %s2550_s6 = inlined_call_operand.vmem [shape: f32[1,128], index: 6, kind: input, shape index: {}]   ;;  %s2551_s7 = inlined_call_operand.vmem [shape: f32[1,128], index: 7, kind: input, shape index: {}]   ;;  %s2552_s8 = inlined_call_operand.vmem [shape: f32[1,128], index: 8, kind: input, shape index: {}]   ;;  %s2553_s9 = inlined_call_operand.vmem [shape: f32[128,4], index: 9, kind: input, shape index: {}]   ;;  %s2554_s10 = inlined_call_operand.hbm [shape: f32[2,32,128], index: 10, kind: output, shape index: {}]  }
   0x1   :  { %16 = vsyncpa [#allocation6], 0 }
   0x2   :  { %17 = vsyncpa [#allocation4], 0  ;;  %s26_s15 = sshll.u32 %s2546_s2, 4  ;;  %s1670_s16 = smov [#allocation2]   ;;  %s27_s15 = int_to_ptr.hbm [resolvable:$true] %s26_s15 }
   0x3   :  { %s28_s17 = sshll.u32 %s1670_s16, 4  ;;  %s41_s20 = sshll.u32 %s2548_s4, 4  ;;  %s29_s17 = int_to_ptr.vmem [resolvable:$true] %s28_s17  ;;  %s42_s20 = int_to_ptr.hbm [resolvable:$true] %s41_s20 }
   0x4   :  { %s1671_s21 = smov 128   ;;  %s1672_s22 = smov 8  }
   0x5   :  { %34 = dma.hbm_to_vmem [thread:$0]  %s27_s15, 6144, %s29_s17, [#allocation3], %s1671_s21, %s1671_s21, %s1672_s22  }
   0x6   :  { %s1673_s23 = smov [#allocation5]  }
   0x7   :  { %s43_s24 = sshll.u32 %s1673_s23, 4  ;;  %s44_s24 = int_to_ptr.vmem [resolvable:$true] %s43_s24 }
   0x8   :  { %49 = dma.hbm_to_vmem [thread:$0]  %s42_s20, 6144, %s44_s24, [#allocation6], %s1671_s21, %s1671_s21, %s1672_s22  }
   0x9   :  { %1664 = dma.done.wait [#allocation3], 6144  }
   0xa   :  { %1665 = vsyncadd [#allocation3], 4294961152 }
   0xb   :  { %1666 = dma.done.wait [#allocation6], 6144  }
   0xc   :  { %1667 = vsyncadd [#allocation6], 4294961152  ;;  %v85_v0 = vld [vmem:[%s2544_s0 + $0x8] sm:$0xff]  ;;  %v84_v1 = vld [vmem:[%s2544_s0] sm:$0xff]  ;;  %vm90_vm0 = vcmask 130048   ;;  %vm651_vm1 = vcmask 31744  }
   0xd   :  { %117 = vmatpush.msra.mxu2 %v85_v0  ;;  %179 = vmatpush.msra.mxu3 %v85_v0  ;;  %v1751_v2 = vld [vmem:[%s2545_s1] sm:$0xff]  ;;  %v210_v5 = vld [vmem:[#allocation2 + $0xf8] sm:$0xff]  ;;  %v209_v7 = vld [vmem:[#allocation2 + $0xf0] sm:$0xff]  ;;  %vm771_vm5 = vcmask 261120   ;;  %s1435_s28 = sshll.u32 %s2554_s10, 4  ;;  %s1436_s28 = int_to_ptr.hbm [resolvable:$true] %s1435_s28 }
   0xe   :  { %v1756_v3 = vld [vmem:[%s2545_s1 + $0x20] sm:$0xff]  ;;  %300 = vmatpush.msra.mxu0 %v85_v0  ;;  %v1767_v6 = vld [vmem:[#allocation2 + $0x78] sm:$0xff]  ;;  %v1769_v8 = vld [vmem:[#allocation2 + $0x70] sm:$0xff] }
   0xf   :  { %118 = vmatpush.msra.mxu2 %v84_v1  ;;  %180 = vmatpush.msra.mxu3 %v84_v1  ;;  %v1761_v4 = vld [vmem:[%s2545_s1 + $0x40] sm:$0xff]  ;;  %v208_v9 = vld [vmem:[#allocation2 + $0xe8] sm:$0xff]  ;;  %v1777_v12 = vld [vmem:[#allocation2 + $0x178] sm:$0xff] }
  0x10   :  { %1449 = vmatmul.msk.f32.vlgmr.msra.gmra.mxu2 %vm90_vm0, %v1751_v2  ;;  %1457 = vmatmul.msk.f32.vlgmr.msra.gmra.mxu3 %vm90_vm0, %v1756_v3  ;;  %v1774_v10 = vld [vmem:[#allocation2 + $0x68] sm:$0xff]  ;;  %v207_v11 = vld [vmem:[#allocation2 + $0xe0] sm:$0xff]  ;;  %v1790_v15 = vld [vmem:[#allocation2 + $0x170] sm:$0xff] }
  0x11   :  { %301 = vmatpush.msra.mxu0 %v84_v1  ;;  %211 = vmatpush.msrb.mxu2 %v210_v5  ;;  %v1782_v13 = vld [vmem:[%s2545_s1 + $0x8] sm:$0xff]  ;;  %v1793_v16 = vld [vmem:[#allocation2 + $0x60] sm:$0xff]  ;;  %v206_v17 = vld [vmem:[#allocation2 + $0xd8] sm:$0xff] }
  0x12   :  { %1465 = vmatmul.msk.f32.vlgmr.msra.gmra.mxu0 %vm90_vm0, %v1761_v4  ;;  %240 = vmatpush.msrb.mxu3 %v1767_v6  ;;  %v1787_v14 = vld [vmem:[%s2545_s1 + $0x28] sm:$0xff]  ;;  %v1807_v20 = vld [vmem:[#allocation2 + $0x58] sm:$0xff]  ;;  %v205_v21 = vld [vmem:[#allocation2 + $0xd0] sm:$0xff] }
  0x13   :  { %212 = vmatpush.msrb.mxu2 %v209_v7  ;;  %450 = vmatpush.msrb.mxu0 %v210_v5  ;;  %v1798_v18 = vld [vmem:[%s2545_s1 + $0x48] sm:$0xff]  ;;  %v1810_v22 = vld [vmem:[#allocation2 + $0x160] sm:$0xff]  ;;  %v1814_v23 = vld [vmem:[#allocation2 + $0x50] sm:$0xff] }
  0x14   :  { %241 = vmatpush.msrb.mxu3 %v1769_v8  ;;  %332 = vmatpush.msra.mxu1 %v1777_v12  ;;  %v1801_v19 = vld [vmem:[#allocation2 + $0x168] sm:$0xff]  ;;  %v1820_v25 = vld [vmem:[#allocation2 + $0x158] sm:$0xff]  ;;  %v1824_v27 = vld [vmem:[#allocation2 + $0xc0] sm:$0xff] }
  0x15   :  { %213 = vmatpush.msrb.mxu2 %v208_v9  ;;  %451 = vmatpush.msrb.mxu0 %v209_v7  ;;  %v1816_v24 = vld [vmem:[#allocation2 + $0xc8] sm:$0xff]  ;;  %v1830_v28 = vld [vmem:[%s2545_s1 + $0x10] sm:$0xff]  ;;  %v1839_v30 = vld [vmem:[#allocation2 + $0x40] sm:$0xff] }
  0x16   :  { %242 = vmatpush.msrb.mxu3 %v1774_v10  ;;  %333 = vmatpush.msra.mxu1 %v1790_v15  ;;  %v1822_v26 = vld [vmem:[#allocation2 + $0x48] sm:$0xff]  ;;  %v1835_v29 = vld [vmem:[%s2545_s1 + $0x30] sm:$0xff]  ;;  %v202_v31 = vld [vmem:[#allocation2 + $0xb8] sm:$0xff] }
  0x17   :  { %214 = vmatpush.msrb.mxu2 %v207_v11  ;;  %452 = vmatpush.msrb.mxu0 %v208_v9  ;;  %v1845_v32 = vld [vmem:[%s2545_s1 + $0x50] sm:$0xff]  ;;  %v1855_v34 = vld [vmem:[#allocation2 + $0x38] sm:$0xff]  ;;  %v1858_v36 = vld [vmem:[#allocation2 + $0x148] sm:$0xff] }
  0x18   :  { %1450 = vmatmul.msk.f32.gmra.mxu2 %vm90_vm0, %v1782_v13  ;;  %1458 = vmatmul.msk.f32.gmra.mxu3 %vm90_vm0, %v1787_v14  ;;  %v1849_v33 = vld [vmem:[#allocation2 + $0x150] sm:$0xff]  ;;  %v200_v38 = vld [vmem:[#allocation2 + $0xa8] sm:$0xff]  ;;  %v1866_v39 = vld [vmem:[#allocation2 + $0x140] sm:$0xff] }
  0x19   :  { %243 = vmatpush.msrb.mxu3 %v1793_v16  ;;  %215 = vmatpush.msrb.mxu2 %v206_v17  ;;  %v201_v35 = vld [vmem:[#allocation2 + $0xb0] sm:$0xff]  ;;  %v1868_v40 = vld [vmem:[#allocation2 + $0x28] sm:$0xff]  ;;  %v199_v41 = vld [vmem:[#allocation2 + $0xa0] sm:$0xff] }
  0x1a   :  { %1466 = vmatmul.msk.f32.gmra.mxu0 %vm90_vm0, %v1798_v18  ;;  %334 = vmatpush.msra.mxu1 %v1801_v19  ;;  %v1862_v37 = vld [vmem:[#allocation2 + $0x30] sm:$0xff]  ;;  %v1874_v42 = vld [vmem:[%s2545_s1 + $0x18] sm:$0xff]  ;;  %v1882_v44 = vld [vmem:[#allocation2 + $0x20] sm:$0xff] }
  0x1b   :  { %244 = vmatpush.msrb.mxu3 %v1807_v20  ;;  %216 = vmatpush.msrb.mxu2 %v205_v21  ;;  %v1879_v43 = vld [vmem:[%s2545_s1 + $0x38] sm:$0xff]  ;;  %v197_v49 = vld [vmem:[#allocation2 + $0x90] sm:$0xff]  ;;  %v196_v52 = vld [vmem:[#allocation2 + $0x88] sm:$0xff] }
  0x1c   :  { %335 = vmatpush.msra.mxu1 %v1810_v22  ;;  %453 = vmatpush.msrb.mxu0 %v207_v11  ;;  %v198_v45 = vld [vmem:[#allocation2 + $0x98] sm:$0xff]  ;;  %v1900_v50 = vld [vmem:[#allocation2 + $0x130] sm:$0xff]  ;;  %v1908_v53 = vld [vmem:[#allocation2 + $0x128] sm:$0xff] }
  0x1d   :  { %245 = vmatpush.msrb.mxu3 %v1814_v23  ;;  %217 = vmatpush.msrb.mxu2 %v1816_v24  ;;  %v1888_v46 = vld [vmem:[%s2545_s1 + $0x58] sm:$0xff]  ;;  %v1905_v51 = vld [vmem:[#allocation2 + $0x10] sm:$0xff]  ;;  %v1911_v54 = vld [vmem:[#allocation2 + $0x8] sm:$0xff] }
  0x1e   :  { %336 = vmatpush.msra.mxu1 %v1820_v25  ;;  %454 = vmatpush.msrb.mxu0 %v206_v17  ;;  %v1891_v47 = vld [vmem:[#allocation2 + $0x138] sm:$0xff]  ;;  %v195_v55 = vld [vmem:[#allocation2 + $0x80] sm:$0xff]  ;;  %v1926_v60 = vld [vmem:[#allocation2 + $0x110] sm:$0xff] }
  0x1f   :  { %246 = vmatpush.msrb.mxu3 %v1822_v26  ;;  %218 = vmatpush.msrb.mxu2 %v1824_v27  ;;  %v1897_v48 = vld [vmem:[#allocation2 + $0x18] sm:$0xff]  ;;  %v132_v56 = vld [vmem:[#allocation2] sm:$0xff]  ;;  %v1929_v61 = vld [vmem:[#allocation2 + $0x108] sm:$0xff] }
  0x20   :  { %1451 = vmatmul.msk.f32.gmra.mxu2 %vm90_vm0, %v1830_v28  ;;  %1459 = vmatmul.msk.f32.gmra.mxu3 %vm90_vm0, %v1835_v29  ;;  %v1918_v57 = vld [vmem:[#allocation2 + $0x120] sm:$0xff]  ;;  %v1921_v58 = vld [vmem:[#allocation2 + $0x118] sm:$0xff]  ;;  %v1469_v63 = vld [vmem:[%s2544_s0 + $0x10] sm:$0xff] }
  0x21   :  { %247 = vmatpush.msrb.mxu3 %v1839_v30  ;;  %219 = vmatpush.msrb.mxu2 %v202_v31  ;;  %v1470_v59 = vld [vmem:[%s2544_s0 + $0x18] sm:$0xff]  ;;  %v1933_v62 = vld [vmem:[#allocation2 + $0x100] sm:$0xff] }
  0x22   :  { %1467 = vmatmul.msk.f32.gmra.mxu0 %vm90_vm0, %v1845_v32  ;;  %337 = vmatpush.msra.mxu1 %v1849_v33 }
  0x23   :  { %248 = vmatpush.msrb.mxu3 %v1855_v34  ;;  %220 = vmatpush.msrb.mxu2 %v201_v35 }
  0x24   :  { %338 = vmatpush.msra.mxu1 %v1858_v36  ;;  %455 = vmatpush.msrb.mxu0 %v205_v21 }
  0x25   :  { %249 = vmatpush.msrb.mxu3 %v1862_v37  ;;  %221 = vmatpush.msrb.mxu2 %v200_v38 }
  0x26   :  { %339 = vmatpush.msra.mxu1 %v1866_v39  ;;  %456 = vmatpush.msrb.mxu0 %v1816_v24 }
  0x27   :  { %250 = vmatpush.msrb.mxu3 %v1868_v40  ;;  %222 = vmatpush.msrb.mxu2 %v199_v41 }
  0x28   :  { %1452 = vmatmul.msk.f32.gmra.mxu2 %vm90_vm0, %v1874_v42  ;;  %1460 = vmatmul.msk.f32.gmra.mxu3 %vm90_vm0, %v1879_v43 }
  0x29   :  { %251 = vmatpush.msrb.mxu3 %v1882_v44  ;;  %223 = vmatpush.msrb.mxu2 %v198_v45 }
  0x2a   :  { %1468 = vmatmul.msk.f32.gmra.mxu0 %vm90_vm0, %v1888_v46  ;;  %340 = vmatpush.msra.mxu1 %v1891_v47 }
  0x2b   :  { %252 = vmatpush.msrb.mxu3 %v1897_v48  ;;  %224 = vmatpush.msrb.mxu2 %v197_v49 }
  0x2c   :  { %341 = vmatpush.msra.mxu1 %v1900_v50  ;;  %457 = vmatpush.msrb.mxu0 %v1824_v27 }
  0x2d   :  { %253 = vmatpush.msrb.mxu3 %v1905_v51  ;;  %225 = vmatpush.msrb.mxu2 %v196_v52 }
  0x2e   :  { %342 = vmatpush.msra.mxu1 %v1908_v53  ;;  %458 = vmatpush.msrb.mxu0 %v202_v31 }
  0x2f   :  { %254 = vmatpush.msrb.mxu3 %v1911_v54  ;;  %226 = vmatpush.msrb.mxu2 %v195_v55 }
  0x30   :  { %459 = vmatpush.msrb.mxu0 %v201_v35  ;;  %343 = vmatpush.msra.mxu1 %v1918_v57 }
  0x31   :  { %255 = vmatpush.msrb.mxu3 %v132_v56  ;;  %406 = vmatpush.msra.mxu2 %v1470_v59 }
  0x32   :  { %460 = vmatpush.msrb.mxu0 %v200_v38  ;;  %344 = vmatpush.msra.mxu1 %v1921_v58 }
  0x33   :  { %435 = vmatpush.msra.mxu3 %v1470_v59  ;;  %407 = vmatpush.msra.mxu2 %v1469_v63 }
  0x34   :  { %461 = vmatpush.msrb.mxu0 %v199_v41  ;;  %345 = vmatpush.msra.mxu1 %v1926_v60 }
  0x35   :  { %436 = vmatpush.msra.mxu3 %v1469_v63 }
  0x36   :  { %462 = vmatpush.msrb.mxu0 %v198_v45  ;;  %346 = vmatpush.msra.mxu1 %v1929_v61 }
  0x38   :  { %463 = vmatpush.msrb.mxu0 %v197_v49  ;;  %347 = vmatpush.msra.mxu1 %v1933_v62  ;;  %v2054_v49 = vld [vmem:[%s2553_s9 + $0x40] sm:$0xff] }
  0x3a   :  { %464 = vmatpush.msrb.mxu0 %v196_v52  ;;  %479 = vmatpush.msrb.mxu1 %v1767_v6 }
  0x3c   :  { %465 = vmatpush.msrb.mxu0 %v195_v55  ;;  %480 = vmatpush.msrb.mxu1 %v1769_v8 }
  0x3e   :  { %481 = vmatpush.msrb.mxu1 %v1774_v10 }
  0x40   :  { %482 = vmatpush.msrb.mxu1 %v1793_v16 }
  0x42   :  { %483 = vmatpush.msrb.mxu1 %v1807_v20 }
  0x44   :  { %484 = vmatpush.msrb.mxu1 %v1814_v23 }
  0x46   :  { %485 = vmatpush.msrb.mxu1 %v1822_v26 }
  0x48   :  { %486 = vmatpush.msrb.mxu1 %v1839_v30 }
  0x4a   :  { %487 = vmatpush.msrb.mxu1 %v1855_v34 }
  0x4c   :  { %488 = vmatpush.msrb.mxu1 %v1862_v37 }
  0x4e   :  { %489 = vmatpush.msrb.mxu1 %v1868_v40  ;;  %v2012_v40 = vld [vmem:[%s2553_s9 + $0x70] sm:$0xff] }
  0x50   :  { %490 = vmatpush.msrb.mxu1 %v1882_v44  ;;  %v2033_v44 = vld [vmem:[%s2553_s9 + $0x58] sm:$0xff] }
  0x52   :  { %491 = vmatpush.msrb.mxu1 %v1897_v48  ;;  %v2047_v48 = vld [vmem:[%s2553_s9 + $0x48] sm:$0xff] }
  0x54   :  { %492 = vmatpush.msrb.mxu1 %v1905_v51  ;;  %v2068_v51 = vld [vmem:[%s2553_s9 + $0x30] sm:$0xff] }
  0x56   :  { %493 = vmatpush.msrb.mxu1 %v1911_v54 }
  0x58   :  { %494 = vmatpush.msrb.mxu1 %v132_v56  ;;  %v2082_v56 = vld [vmem:[%s2553_s9 + $0x20] sm:$0xff] }
  0x8f   :  { %v303_v0 = vpop.f32.mrf.mxu0 }
  0x90   :  { %348 = vmatmul.f32.vlgmr.msra.gmra.mxu1 %v303_v0 }
  0x93   :  { %v120_v1 = vpop.f32.mrf.mxu2  ;;  %v182_v5 = vpop.f32.mrf.mxu3 }
  0x94   :  { %227 = vmatmul.f32.vlgmr.msrb.gmra.mxu2 %v182_v5  ;;  %256 = vmatmul.f32.vlgmr.msrb.gmra.mxu3 %v120_v1 }
  0x95   :  { %522 = vmatpush.msrb.mxu2 %v1470_v59  ;;  %537 = vmatpush.msrb.mxu3 %v1777_v12  ;;  %v2099_v59 = vld [vmem:[%s2553_s9 + $0x10] sm:$0xff] }
  0x97   :  { %v306_v6 = vpop.f32.mrf.mxu0  ;;  %523 = vmatpush.msrb.mxu2 %v1469_v63  ;;  %538 = vmatpush.msrb.mxu3 %v1790_v15  ;;  %v2117_v63 = vld [vmem:[%s2553_s9] sm:$0xff] }
  0x98   :  { %351 = vmatmul.f32.gmra.mxu1 %v306_v6 }
  0x99   :  { %539 = vmatpush.msrb.mxu3 %v1801_v19 }
  0x9b   :  { %v123_v7 = vpop.f32.mrf.mxu2  ;;  %v185_v8 = vpop.f32.mrf.mxu3  ;;  %540 = vmatpush.msrb.mxu3 %v1810_v22 }
  0x9c   :  { %230 = vmatmul.f32.gmra.mxu2 %v185_v8  ;;  %259 = vmatmul.f32.gmra.mxu3 %v123_v7 }
  0x9d   :  { %541 = vmatpush.msrb.mxu3 %v1820_v25 }
  0x9f   :  { %v309_v9 = vpop.f32.mrf.mxu0  ;;  %542 = vmatpush.msrb.mxu3 %v1849_v33 }
  0xa0   :  { %354 = vmatmul.f32.gmra.mxu1 %v309_v9 }
  0xa1   :  { %543 = vmatpush.msrb.mxu3 %v1858_v36 }
  0xa3   :  { %v126_v10 = vpop.f32.mrf.mxu2  ;;  %v188_v11 = vpop.f32.mrf.mxu3  ;;  %544 = vmatpush.msrb.mxu3 %v1866_v39  ;;  %v2005_v39 = vld [vmem:[%s2553_s9 + $0x78] sm:$0xff] }
  0xa4   :  { %233 = vmatmul.f32.gmra.mxu2 %v188_v11  ;;  %262 = vmatmul.f32.gmra.mxu3 %v126_v10 }
  0xa5   :  { %545 = vmatpush.msrb.mxu3 %v1891_v47  ;;  %596 = vmatpush.msra.mxu0 %v2005_v39 }
  0xa6   :  { %616 = vmatpush.msra.mxu1 %v2005_v39 }
  0xa7   :  { %v312_v12 = vpop.f32.mrf.mxu0  ;;  %546 = vmatpush.msrb.mxu3 %v1900_v50  ;;  %597 = vmatpush.msra.mxu0 %v2012_v40  ;;  %v2061_v50 = vld [vmem:[%s2553_s9 + $0x38] sm:$0xff] }
  0xa8   :  { %357 = vmatmul.f32.gmra.mxu1 %v312_v12 }
  0xa9   :  { %547 = vmatpush.msrb.mxu3 %v1908_v53  ;;  %617 = vmatpush.msra.mxu1 %v2012_v40  ;;  %v2075_v53 = vld [vmem:[%s2553_s9 + $0x28] sm:$0xff] }
  0xab   :  { %v129_v15 = vpop.f32.mrf.mxu2  ;;  %v191_v16 = vpop.f32.mrf.mxu3  ;;  %548 = vmatpush.msrb.mxu3 %v1918_v57  ;;  %v2089_v57 = vld [vmem:[%s2553_s9 + $0x18] sm:$0xff] }
  0xac   :  { %236 = vmatmul.f32.gmra.mxu2 %v191_v16  ;;  %265 = vmatmul.f32.gmra.mxu3 %v129_v15 }
  0xad   :  { %549 = vmatpush.msrb.mxu3 %v1921_v58 }
  0xaf   :  { %550 = vmatpush.msrb.mxu3 %v1926_v60  ;;  %v2104_v60 = vld [vmem:[%s2553_s9 + $0x8] sm:$0xff] }
  0xb1   :  { %551 = vmatpush.msrb.mxu3 %v1929_v61 }
  0xb3   :  { %552 = vmatpush.msrb.mxu3 %v1933_v62 }
  0xb4   :  { %1471 = vmatmul.msk.f32.vlgmr.msra.gmra.mxu2 %vm90_vm0, %v1751_v2  ;;  %1475 = vmatmul.msk.f32.vlgmr.msra.gmra.mxu3 %vm90_vm0, %v1756_v3 }
  0xb5   :  { %1483 = vmatpush.xpose.msk.msra.mxu2 %vm651_vm1, %v2005_v39  ;;  %1500 = vmatpush.xpose.msk.msra.mxu3 %vm651_vm1, %v2005_v39 }
  0xb9   :  { %1484 = vmatpush.xpose.msk.msra.mxu2 %vm651_vm1, %v2012_v40  ;;  %1501 = vmatpush.xpose.msk.msra.mxu3 %vm651_vm1, %v2012_v40 }
  0xbc   :  { %1472 = vmatmul.msk.f32.gmra.mxu2 %vm90_vm0, %v1782_v13  ;;  %1476 = vmatmul.msk.f32.gmra.mxu3 %vm90_vm0, %v1787_v14 }
  0xc4   :  { %1473 = vmatmul.msk.f32.gmra.mxu2 %vm90_vm0, %v1830_v28  ;;  %1477 = vmatmul.msk.f32.gmra.mxu3 %vm90_vm0, %v1835_v29 }
  0xcc   :  { %1474 = vmatmul.msk.f32.gmra.mxu2 %vm90_vm0, %v1874_v42  ;;  %1478 = vmatmul.msk.f32.gmra.mxu3 %vm90_vm0, %v1879_v43  ;;  %v2019_v42 = vld [vmem:[%s2553_s9 + $0x68] sm:$0xff]  ;;  %v2026_v43 = vld [vmem:[%s2553_s9 + $0x60] sm:$0xff] }
  0xcd   :  { %598 = vmatpush.msra.mxu0 %v2019_v42  ;;  %618 = vmatpush.msra.mxu1 %v2019_v42 }
  0xce   :  { %1485 = vmatpush.xpose.msk.msra.mxu2 %vm651_vm1, %v2019_v42  ;;  %1502 = vmatpush.xpose.msk.msra.mxu3 %vm651_vm1, %v2019_v42 }
  0xcf   :  { %599 = vmatpush.msra.mxu0 %v2026_v43  ;;  %619 = vmatpush.msra.mxu1 %v2026_v43 }
  0xd1   :  { %600 = vmatpush.msra.mxu0 %v2033_v44  ;;  %620 = vmatpush.msra.mxu1 %v2033_v44 }
  0xd2   :  { %1486 = vmatpush.xpose.msk.msra.mxu2 %vm651_vm1, %v2026_v43  ;;  %1503 = vmatpush.xpose.msk.msra.mxu3 %vm651_vm1, %v2026_v43 }
  0xd4   :  { %1479 = vmatmul.msk.f32.vlgmr.msrb.gmra.mxu2 %vm90_vm0, %v1761_v4 }
  0xd6   :  { %1487 = vmatpush.xpose.msk.msra.mxu2 %vm651_vm1, %v2033_v44  ;;  %1504 = vmatpush.xpose.msk.msra.mxu3 %vm651_vm1, %v2033_v44 }
  0xdc   :  { %1480 = vmatmul.msk.f32.gmra.mxu2 %vm90_vm0, %v1798_v18 }
  0xe4   :  { %1481 = vmatmul.msk.f32.gmra.mxu2 %vm90_vm0, %v1845_v32 }
  0xec   :  { %1482 = vmatmul.msk.f32.gmra.mxu2 %vm90_vm0, %v1888_v46  ;;  %v2040_v46 = vld [vmem:[%s2553_s9 + $0x50] sm:$0xff] }
  0xed   :  { %601 = vmatpush.msra.mxu0 %v2040_v46  ;;  %621 = vmatpush.msra.mxu1 %v2040_v46 }
  0xee   :  { %1488 = vmatpush.xpose.msk.msra.mxu2 %vm651_vm1, %v2040_v46  ;;  %1505 = vmatpush.xpose.msk.msra.mxu3 %vm651_vm1, %v2040_v46 }
  0xef   :  { %602 = vmatpush.msra.mxu0 %v2047_v48  ;;  %622 = vmatpush.msra.mxu1 %v2047_v48 }
  0xf1   :  { %603 = vmatpush.msra.mxu0 %v2054_v49  ;;  %623 = vmatpush.msra.mxu1 %v2054_v49 }
  0xf2   :  { %1489 = vmatpush.xpose.msk.msra.mxu2 %vm651_vm1, %v2047_v48  ;;  %1506 = vmatpush.xpose.msk.msra.mxu3 %vm651_vm1, %v2047_v48 }
  0xf3   :  { %604 = vmatpush.msra.mxu0 %v2061_v50  ;;  %624 = vmatpush.msra.mxu1 %v2061_v50 }
  0xf5   :  { %605 = vmatpush.msra.mxu0 %v2068_v51  ;;  %625 = vmatpush.msra.mxu1 %v2068_v51 }
  0xf6   :  { %1490 = vmatpush.xpose.msk.msra.mxu2 %vm651_vm1, %v2054_v49  ;;  %1507 = vmatpush.xpose.msk.msra.mxu3 %vm651_vm1, %v2054_v49 }
  0xf7   :  { %606 = vmatpush.msra.mxu0 %v2075_v53  ;;  %626 = vmatpush.msra.mxu1 %v2075_v53 }
  0xf9   :  { %607 = vmatpush.msra.mxu0 %v2082_v56  ;;  %627 = vmatpush.msra.mxu1 %v2082_v56 }
  0xfa   :  { %1491 = vmatpush.xpose.msk.msra.mxu2 %vm651_vm1, %v2061_v50  ;;  %1508 = vmatpush.xpose.msk.msra.mxu3 %vm651_vm1, %v2061_v50 }
  0xfb   :  { %608 = vmatpush.msra.mxu0 %v2089_v57  ;;  %628 = vmatpush.msra.mxu1 %v2089_v57 }
  0xfd   :  { %609 = vmatpush.msra.mxu0 %v2099_v59  ;;  %629 = vmatpush.msra.mxu1 %v2099_v59 }
  0xfe   :  { %1492 = vmatpush.xpose.msk.msra.mxu2 %vm651_vm1, %v2068_v51  ;;  %1509 = vmatpush.xpose.msk.msra.mxu3 %vm651_vm1, %v2068_v51 }
  0xff   :  { %610 = vmatpush.msra.mxu0 %v2104_v60  ;;  %630 = vmatpush.msra.mxu1 %v2104_v60 }
 0x101   :  { %611 = vmatpush.msra.mxu0 %v2117_v63  ;;  %631 = vmatpush.msra.mxu1 %v2117_v63 }
 0x102   :  { %1493 = vmatpush.xpose.msk.msra.mxu2 %vm651_vm1, %v2075_v53  ;;  %1510 = vmatpush.xpose.msk.msra.mxu3 %vm651_vm1, %v2075_v53 }
 0x106   :  { %1494 = vmatpush.xpose.msk.msra.mxu2 %vm651_vm1, %v2082_v56  ;;  %1511 = vmatpush.xpose.msk.msra.mxu3 %vm651_vm1, %v2082_v56 }
 0x10a   :  { %1495 = vmatpush.xpose.msk.msra.mxu2 %vm651_vm1, %v2089_v57  ;;  %1512 = vmatpush.xpose.msk.msra.mxu3 %vm651_vm1, %v2089_v57 }
 0x10d   :  { %v349_v36 = vpop.f32.mrf.mxu1 }
 0x10e   :  { %1496 = vmatpush.xpose.msk.msra.mxu2 %vm651_vm1, %v2099_v59  ;;  %1513 = vmatpush.xpose.msk.msra.mxu3 %vm651_vm1, %v2099_v59 }
 0x112   :  { %1497 = vmatpush.xpose.msk.msra.mxu2 %vm651_vm1, %v2104_v60  ;;  %1514 = vmatpush.xpose.msk.msra.mxu3 %vm651_vm1, %v2104_v60 }
 0x115   :  { %v352_v37 = vpop.f32.mrf.mxu1 }
 0x116   :  { %1498 = vmatpush.xpose.msk.msra.mxu2 %vm651_vm1, %v2117_v63  ;;  %1515 = vmatpush.xpose.msk.msra.mxu3 %vm651_vm1, %v2117_v63 }
 0x117   :  { %v228_v2 = vpop.f32.mrf.mxu2  ;;  %v257_v3 = vpop.f32.mrf.mxu3 }
 0x118   :  { %v1994_v13 = vadd.f32 %v257_v3, %v228_v2 }
 0x11a   :  { %v2109_v61 = vadd.f32 %v349_v36, %v1994_v13 }
 0x11c   :  { %v375_v9 = vmul.f32 %v2109_v61, %v2109_v61 }
 0x11d   :  { %v355_v38 = vpop.f32.mrf.mxu1 }
 0x11f   :  { %v231_v14 = vpop.f32.mrf.mxu2  ;;  %v260_v17 = vpop.f32.mrf.mxu3 }
 0x120   :  { %v1996_v19 = vadd.f32 %v260_v17, %v231_v14 }
 0x122   :  { %v2094_v58 = vadd.f32 %v352_v37, %v1996_v19 }
 0x124   :  { %v376_v1 = vmul.f32 %v2094_v58, %v2094_v58  ;;  %v365_v6 = vadd.f32 %v2094_v58, %v2109_v61 }
 0x125   :  { %v358_v41 = vpop.f32.mrf.mxu1 }
 0x126   :  { %v379_v12 = vadd.f32 %v376_v1, %v375_v9 }
 0x127   :  { %v234_v20 = vpop.f32.mrf.mxu2  ;;  %v263_v21 = vpop.f32.mrf.mxu3 }
 0x128   :  { %v1998_v4 = vadd.f32 %v263_v21, %v234_v20 }
 0x12a   :  { %v2112_v62 = vadd.f32 %v355_v38, %v1998_v4 }
 0x12c   :  { %v377_v10 = vmul.f32 %v2112_v62, %v2112_v62  ;;  %v366_v11 = vadd.f32 %v365_v6, %v2112_v62 }
 0x12e   :  { %v380_v2 = vadd.f32 %v379_v12, %v377_v10 }
 0x12f   :  { %v237_v22 = vpop.f32.mrf.mxu2  ;;  %v266_v18 = vpop.f32.mrf.mxu3 }
 0x130   :  { %v2000_v23 = vadd.f32 %v266_v18, %v237_v22 }
 0x132   :  { %v2124_v5 = vadd.f32 %v358_v41, %v2000_v23 }
 0x134   :  { %v378_v15 = vmul.f32 %v2124_v5, %v2124_v5  ;;  %v367_v16 = vadd.f32 %v366_v11, %v2124_v5 }
 0x136   :  { %v381_v14 = vadd.f32 %v380_v2, %v378_v15  ;;  %v368_v21 = vrot.slane %v367_v16, 4 }
 0x137   :  { %v409_v24 = vpop.f32.mrf.mxu2  ;;  %v438_v25 = vpop.f32.mrf.mxu3 }
 0x138   :  { %466 = vmatmul.f32.vlgmr.msrb.gmra.mxu0 %v438_v25  ;;  %495 = vmatmul.f32.vlgmr.msrb.gmra.mxu1 %v409_v24  ;;  %v382_v24 = vrot.slane %v381_v14, 4 }
 0x13f   :  { %v412_v26 = vpop.f32.mrf.mxu2  ;;  %v441_v27 = vpop.f32.mrf.mxu3 }
 0x140   :  { %469 = vmatmul.f32.gmra.mxu0 %v441_v27  ;;  %498 = vmatmul.f32.gmra.mxu1 %v412_v26  ;;  %v369_v26 = vadd.f32 %v368_v21, %v367_v16 }
 0x142   :  { %v370_v36 = vrot.slane %v369_v26, 2 }
 0x147   :  { %v415_v28 = vpop.f32.mrf.mxu2  ;;  %v444_v29 = vpop.f32.mrf.mxu3 }
 0x148   :  { %472 = vmatmul.f32.gmra.mxu0 %v444_v29  ;;  %501 = vmatmul.f32.gmra.mxu1 %v415_v28 }
 0x14f   :  { %v418_v30 = vpop.f32.mrf.mxu2  ;;  %v447_v31 = vpop.f32.mrf.mxu3 }
 0x150   :  { %475 = vmatmul.f32.gmra.mxu0 %v447_v31  ;;  %504 = vmatmul.f32.gmra.mxu1 %v418_v30 }
 0x157   :  { %v525_v32 = vpop.f32.mrf.mxu2 }
 0x158   :  { %553 = vmatmul.f32.vlgmr.msrb.gmra.mxu3 %v525_v32  ;;  %v383_v32 = vadd.f32 %v382_v24, %v381_v14 }
 0x15f   :  { %v528_v33 = vpop.f32.mrf.mxu2 }
 0x160   :  { %556 = vmatmul.f32.gmra.mxu3 %v528_v33 }
 0x167   :  { %v531_v34 = vpop.f32.mrf.mxu2 }
 0x168   :  { %559 = vmatmul.f32.gmra.mxu3 %v531_v34 }
 0x16f   :  { %v534_v35 = vpop.f32.mrf.mxu2 }
 0x170   :  { %562 = vmatmul.f32.gmra.mxu3 %v534_v35 }
 0x1b5   :  { %v467_v45 = vpop.f32.mrf.mxu0  ;;  %v496_v47 = vpop.f32.mrf.mxu1 }
 0x1b6   :  { %v497_v17 = vadd.f32 %v496_v47, %v467_v45  ;;  %v384_v45 = vrot.slane %v383_v32, 2 }
 0x1b8   :  { %v385_v1 = vadd.f32 %v384_v45, %v383_v32  ;;  %v595_v45 = vld [vmem:[%s2550_s6] sm:$0x1] }
 0x1ba   :  { %v386_v15 = vrot.slane %v385_v1, 1 }
 0x1bc   :  { %v387_v14 = vadd.f32 %v386_v15, %v385_v1 }
 0x1bd   :  { %v470_v52 = vpop.f32.mrf.mxu0  ;;  %v499_v54 = vpop.f32.mrf.mxu1 }
 0x1be   :  { %v500_v3 = vadd.f32 %v499_v54, %v470_v52  ;;  %v371_v54 = vadd.f32 %v370_v36, %v369_v26  ;;  %v594_v36 = vld [vmem:[%s2549_s5] sm:$0x1] }
 0x1c5   :  { %v473_v7 = vpop.f32.mrf.mxu0  ;;  %v502_v8 = vpop.f32.mrf.mxu1 }
 0x1c6   :  { %v503_v19 = vadd.f32 %v502_v8, %v473_v7  ;;  %v372_v8 = vrot.slane %v371_v54, 1 }
 0x1c8   :  { %v373_v16 = vadd.f32 %v372_v8, %v371_v54 }
 0x1cd   :  { %v476_v18 = vpop.f32.mrf.mxu0  ;;  %v505_v23 = vpop.f32.mrf.mxu1 }
 0x1ce   :  { %v506_v27 = vadd.f32 %v505_v23, %v476_v18 }
 0x1db   :  { %v554_v55 = vpop.f32.mrf.mxu3 }
 0x1dc   :  { %v2148_v4 = vadd.f32 %v554_v55, %v497_v17 }
 0x1de   :  { %v580_v28 = vmul.f32 %v2148_v4, %v2148_v4 }
 0x1e3   :  { %v557_v0 = vpop.f32.mrf.mxu3 }
 0x1e4   :  { %v2142_v20 = vadd.f32 %v557_v0, %v500_v3 }
 0x1e6   :  { %v581_v25 = vmul.f32 %v2142_v20, %v2142_v20  ;;  %v570_v29 = vadd.f32 %v2142_v20, %v2148_v4 }
 0x1e8   :  { %v584_v33 = vadd.f32 %v581_v25, %v580_v28 }
 0x1eb   :  { %v560_v13 = vpop.f32.mrf.mxu3 }
 0x1ec   :  { %v2150_v22 = vadd.f32 %v560_v13, %v503_v19 }
 0x1ee   :  { %v582_v30 = vmul.f32 %v2150_v22, %v2150_v22  ;;  %v571_v34 = vadd.f32 %v570_v29, %v2150_v22 }
 0x1f0   :  { %v585_v37 = vadd.f32 %v584_v33, %v582_v30 }
 0x1f3   :  { %v563_v31 = vpop.f32.mrf.mxu3 }
 0x1f4   :  { %v2165_v35 = vadd.f32 %v563_v31, %v506_v27 }
 0x1f6   :  { %v572_v38 = vadd.f32 %v571_v34, %v2165_v35  ;;  %v583_v41 = vmul.f32 %v2165_v35, %v2165_v35 }
 0x1f8   :  { %v573_v47 = vrot.slane %v572_v38, 4  ;;  %v586_v52 = vadd.f32 %v585_v37, %v583_v41 }
 0x1fa   :  { %v574_v55 = vadd.f32 %v573_v47, %v572_v38  ;;  %v587_v0 = vrot.slane %v586_v52, 4 }
 0x1fc   :  { %v575_v6 = vrot.slane %v574_v55, 2  ;;  %v588_v7 = vadd.f32 %v587_v0, %v586_v52 }
 0x1fe   :  { %v576_v9 = vadd.f32 %v575_v6, %v574_v55  ;;  %v589_v10 = vrot.slane %v588_v7, 2 }
 0x200   :  { %v577_v11 = vrot.slane %v576_v9, 1  ;;  %v590_v12 = vadd.f32 %v589_v10, %v588_v7 }
 0x202   :  { %v578_v2 = vadd.f32 %v577_v11, %v576_v9  ;;  %v591_v3 = vrot.slane %v590_v12, 1 }
 0x204   :  { %v579_v13 = vadd.f32 %v578_v2, %v373_v16  ;;  %v592_v17 = vadd.f32 %v591_v3, %v590_v12 }
 0x206   :  { %612 = vmatmul.f32.vlgmr.msra.gmra.mxu0 %v579_v13  ;;  %v593_v19 = vadd.f32 %v592_v17, %v387_v14 }
 0x208   :  { %632 = vmatmul.f32.vlgmr.msra.gmra.mxu1 %v593_v19  ;;  %v2252_v19 = vld [vmem:[%s2547_s3 + $0x20] sm:$0xff] }
 0x283   :  { %v613_v21 = vpop.f32.mrf.mxu0 }
 0x284   :  { %v636_v18 = vmul.f32 0.00048828125, %v613_v21  ;;  %v767_v21 = vld [vmem:[%s2547_s3] sm:$0xff] }
 0x285   :  { %v633_v23 = vpop.f32.mrf.mxu1 }
 0x286   :  { %v638_v24 = vmul.f32 %v636_v18, %v636_v18  ;;  %v637_v25 = vmul.f32 0.00048828125, %v633_v23  ;;  %1499 = vmatmul.msk.f32.vlgmr.msra.gmra.mxu2 %vm651_vm1, %v636_v18  ;;  %v828_v18 = vld [vmem:[#allocation5 + $0x78] sm:$0xff]  ;;  %v2260_v23 = vld [vmem:[%s2547_s3 + $0x40] sm:$0xff] }
 0x288   :  { %v639_v26 = vsub.f32 %v637_v25, %v638_v24  ;;  %v827_v24 = vld [vmem:[#allocation5 + $0x70] sm:$0xff]  ;;  %v826_v25 = vld [vmem:[#allocation5 + $0x68] sm:$0xff] }
 0x28a   :  { %v640_v27 = vadd.f32 1e-05, %v639_v26  ;;  %v825_v26 = vld [vmem:[#allocation5 + $0x60] sm:$0xff] }
 0x28c   :  { %1588 = vrsqrt.f32 %v640_v27  ;;  %vm647_vm3 = vweird.f32 %v640_v27 }
 0x292   :  { %v1589_v28 = vpop.eup %1588 }
 0x293   :  { %v642_v29 = vmul.f32 %v1589_v28, %v640_v27  ;;  %vm648_vm2 = vweird.f32 %v1589_v28  ;;  %v2272_v27 = vld [vmem:[%s2547_s3 + $0x28] sm:$0xff] }
 0x294   :  { %vm649_vm4 = vmor %vm647_vm3, %vm648_vm2 }
 0x295   :  { %v643_v30 = vmul.f32 %v1589_v28, %v642_v29  ;;  %v824_v29 = vld [vmem:[#allocation5 + $0x58] sm:$0xff] }
 0x297   :  { %v644_v31 = vmul.f32 0.5, %v643_v30  ;;  %v2280_v30 = vld [vmem:[%s2547_s3 + $0x48] sm:$0xff] }
 0x299   :  { %v645_v32 = vsub.f32 1.5, %v644_v31  ;;  %v891_v31 = vld [vmem:[#allocation5 + $0xf8] sm:$0xff] }
 0x29b   :  { %v646_v33 = vmul.f32 %v1589_v28, %v645_v32  ;;  %v890_v32 = vld [vmem:[#allocation5 + $0xf0] sm:$0xff] }
 0x29d   :  { %v650_v34 = vsel %vm649_vm4, %v1589_v28, %v646_v33  ;;  %v768_v28 = vld [vmem:[%s2547_s3 + $0x8] sm:$0xff]  ;;  %v823_v33 = vld [vmem:[#allocation5 + $0x50] sm:$0xff] }
 0x29e   :  { %1516 = vmatmul.msk.f32.vlgmr.msra.gmra.mxu3 %vm651_vm1, %v650_v34  ;;  %v889_v34 = vld [vmem:[#allocation5 + $0xe8] sm:$0xff] }
 0x309   :  { %v720_v41 = vpop.f32.mrf.mxu2 }
 0x321   :  { %v743_v37 = vpop.f32.mrf.mxu3 }
 0x322   :  { %v746_v38 = vmul.f32 %v743_v37, %v594_v36  ;;  %v822_v36 = vld [vmem:[#allocation5 + $0x48] sm:$0xff]  ;;  %v888_v37 = vld [vmem:[#allocation5 + $0xe0] sm:$0xff] }
 0x324   :  { %v747_v47 = vmul.f32 %v746_v38, %v720_v41  ;;  %v750_v52 = vperm.slane %v746_v38, 0  ;;  %v821_v38 = vld [vmem:[#allocation5 + $0x40] sm:$0xff]  ;;  %v2291_v41 = vld [vmem:[%s2547_s3 + $0x30] sm:$0xff] }
 0x326   :  { %v748_v54 = vsub.f32 %v595_v45, %v747_v47  ;;  %v755_v0 = vmul.f32 %v750_v52, %v2124_v5  ;;  %v1073_v1 = vmul.f32 %v750_v52, %v2165_v35  ;;  %v754_v6 = vmul.f32 %v750_v52, %v2112_v62  ;;  %v769_v45 = vld [vmem:[%s2547_s3 + $0x10] sm:$0xff]  ;;  %v820_v47 = vld [vmem:[#allocation5 + $0x38] sm:$0xff] }
 0x327   :  { %v1072_v7 = vmul.f32 %v750_v52, %v2150_v22  ;;  %v753_v11 = vmul.f32 %v750_v52, %v2094_v58  ;;  %v1071_v15 = vmul.f32 %v750_v52, %v2142_v20  ;;  %v752_v5 = vmul.f32 %v750_v52, %v2109_v61 }
 0x328   :  { %v757_v55 = vperm.slane %v748_v54, 0  ;;  %v1070_v35 = vmul.f32 %v750_v52, %v2148_v4  ;;  %v2299_v52 = vld [vmem:[%s2547_s3 + $0x50] sm:$0xff]  ;;  %v887_v54 = vld [vmem:[#allocation5 + $0xd8] sm:$0xff] }
 0x32a   :  { %v762_v8 = vadd.f32 %v757_v55, %v755_v0  ;;  %v1077_v9 = vadd.f32 %v1073_v1, %v757_v55  ;;  %v761_v10 = vadd.f32 %v757_v55, %v754_v6  ;;  %v1076_v12 = vadd.f32 %v1072_v7, %v757_v55  ;;  %v886_v0 = vld [vmem:[#allocation5 + $0xd0] sm:$0xff]  ;;  %v818_v1 = vld [vmem:[#allocation5 + $0x28] sm:$0xff]  ;;  %v817_v7 = vld [vmem:[#allocation5 + $0x20] sm:$0xff] }
 0x32b   :  { %v760_v3 = vadd.f32 %v757_v55, %v753_v11  ;;  %v1075_v13 = vadd.f32 %v1071_v15, %v757_v55  ;;  %v759_v22 = vadd.f32 %v757_v55, %v752_v5  ;;  %v1074_v14 = vadd.f32 %v1070_v35, %v757_v55  ;;  %v819_v55 = vld [vmem:[#allocation5 + $0x30] sm:$0xff]  ;;  %v885_v6 = vld [vmem:[#allocation5 + $0xc8] sm:$0xff]  ;;  %v2318_v11 = vld [vmem:[%s2547_s3 + $0x58] sm:$0xff] }
 0x32c   :  { %v766_v16 = vmax.f32 %v762_v8, 0.0  ;;  %v2236_v2 = vmax.f32 %v1077_v9, 0.0  ;;  %v765_v62 = vmax.f32 %v761_v10, 0.0  ;;  %v2241_v58 = vmax.f32 %v1076_v12, 0.0  ;;  %v2310_v8 = vld [vmem:[%s2547_s3 + $0x38] sm:$0xff]  ;;  %v884_v12 = vld [vmem:[#allocation5 + $0xc0] sm:$0xff] }
 0x32d   :  { %v764_v20 = vmax.f32 %v760_v3, 0.0  ;;  %v2244_v61 = vmax.f32 %v1075_v13, 0.0  ;;  %v763_v4 = vmax.f32 %v759_v22, 0.0  ;;  %v2247_v17 = vmax.f32 %v1074_v14, 0.0  ;;  %v770_v9 = vld [vmem:[%s2547_s3 + $0x18] sm:$0xff]  ;;  %v815_v15 = vld [vmem:[#allocation5 + $0x10] sm:$0xff] }
 0x32e   :  { %796 = vmatpush.msrb.mxu0 %v766_v16  ;;  %858 = vmatpush.msrb.mxu1 %v766_v16  ;;  %v816_v10 = vld [vmem:[#allocation5 + $0x18] sm:$0xff]  ;;  %v814_v3 = vld [vmem:[#allocation5 + $0x8] sm:$0xff]  ;;  %v882_v5 = vld [vmem:[#allocation5 + $0xb0] sm:$0xff] }
 0x32f   :  { %979 = vmatpush.msrb.mxu2 %v766_v16  ;;  %1094 = vmatpush.msrb.mxu3 %v2236_v2  ;;  %v883_v16 = vld [vmem:[#allocation5 + $0xb8] sm:$0xff]  ;;  %v813_v13 = vld [vmem:[#allocation5] sm:$0xff]  ;;  %v881_v35 = vld [vmem:[#allocation5 + $0xa8] sm:$0xff] }
 0x330   :  { %797 = vmatpush.msrb.mxu0 %v765_v62  ;;  %859 = vmatpush.msrb.mxu1 %v765_v62  ;;  %v879_v22 = vld [vmem:[#allocation5 + $0x98] sm:$0xff]  ;;  %v878_v14 = vld [vmem:[#allocation5 + $0x90] sm:$0xff] }
 0x331   :  { %980 = vmatpush.msrb.mxu2 %v765_v62  ;;  %1095 = vmatpush.msrb.mxu3 %v2241_v58  ;;  %v880_v62 = vld [vmem:[#allocation5 + $0xa0] sm:$0xff] }
 0x332   :  { %798 = vmatpush.msrb.mxu0 %v764_v20  ;;  %860 = vmatpush.msrb.mxu1 %v764_v20 }
 0x333   :  { %981 = vmatpush.msrb.mxu2 %v764_v20  ;;  %1096 = vmatpush.msrb.mxu3 %v2244_v61  ;;  %v877_v20 = vld [vmem:[#allocation5 + $0x88] sm:$0xff] }
 0x334   :  { %799 = vmatpush.msrb.mxu0 %v763_v4  ;;  %861 = vmatpush.msrb.mxu1 %v763_v4 }
 0x335   :  { %982 = vmatpush.msrb.mxu2 %v763_v4  ;;  %1097 = vmatpush.msrb.mxu3 %v2247_v17  ;;  %v876_v4 = vld [vmem:[#allocation5 + $0x80] sm:$0xff] }
 0x336   :  { %1525 = vmatmul.msk.f32.vlgmr.msrb.gmra.mxu1 %vm771_vm5, %v2252_v19  ;;  %1517 = vmatmul.msk.f32.vlgmr.msrb.gmra.mxu0 %vm771_vm5, %v767_v21 }
 0x337   :  { %921 = vmatpush.msra.mxu1 %v828_v18  ;;  %1533 = vmatmul.msk.f32.vlgmr.msrb.gmra.mxu2 %vm771_vm5, %v2260_v23 }
 0x338   :  { %1537 = vmatmul.msk.f32.vlgmr.msrb.gmra.mxu3 %vm771_vm5, %v767_v21  ;;  %892 = vmatpush.msra.mxu0 %v891_v31  ;;  %v2330_v21 = vld [vmem:[#allocation5 + $0x178] sm:$0xff] }
 0x339   :  { %922 = vmatpush.msra.mxu1 %v827_v24  ;;  %1169 = vmatpush.msra.mxu3 %v828_v18  ;;  %v2332_v18 = vld [vmem:[#allocation5 + $0x170] sm:$0xff] }
 0x33a   :  { %893 = vmatpush.msra.mxu0 %v890_v32  ;;  %1140 = vmatpush.msra.mxu2 %v891_v31  ;;  %v2356_v31 = vld [vmem:[#allocation5 + $0x140] sm:$0xff] }
 0x33b   :  { %923 = vmatpush.msra.mxu1 %v826_v25  ;;  %1170 = vmatpush.msra.mxu3 %v827_v24  ;;  %v2335_v24 = vld [vmem:[#allocation5 + $0x168] sm:$0xff] }
 0x33c   :  { %894 = vmatpush.msra.mxu0 %v889_v34  ;;  %1141 = vmatpush.msra.mxu2 %v890_v32  ;;  %v2361_v32 = vld [vmem:[#allocation5 + $0x138] sm:$0xff] }
 0x33d   :  { %924 = vmatpush.msra.mxu1 %v825_v26  ;;  %1171 = vmatpush.msra.mxu3 %v826_v25  ;;  %v2338_v25 = vld [vmem:[#allocation5 + $0x160] sm:$0xff] }
 0x33e   :  { %1526 = vmatmul.msk.f32.gmra.mxu1 %vm771_vm5, %v2272_v27  ;;  %1518 = vmatmul.msk.f32.gmra.mxu0 %vm771_vm5, %v768_v28 }
 0x33f   :  { %925 = vmatpush.msra.mxu1 %v824_v29  ;;  %1534 = vmatmul.msk.f32.gmra.mxu2 %vm771_vm5, %v2280_v30 }
 0x340   :  { %1538 = vmatmul.msk.f32.gmra.mxu3 %vm771_vm5, %v768_v28  ;;  %895 = vmatpush.msra.mxu0 %v888_v37  ;;  %v2346_v28 = vld [vmem:[#allocation5 + $0x150] sm:$0xff] }
 0x341   :  { %926 = vmatpush.msra.mxu1 %v823_v33  ;;  %1172 = vmatpush.msra.mxu3 %v825_v26  ;;  %v2341_v26 = vld [vmem:[#allocation5 + $0x158] sm:$0xff] }
 0x342   :  { %1142 = vmatpush.msra.mxu2 %v889_v34  ;;  %896 = vmatpush.msra.mxu0 %v887_v54  ;;  %v1002_v34 = vld [vmem:[#allocation5 + $0x128] sm:$0xff] }
 0x343   :  { %927 = vmatpush.msra.mxu1 %v822_v36  ;;  %1173 = vmatpush.msra.mxu3 %v824_v29  ;;  %v2351_v29 = vld [vmem:[#allocation5 + $0x148] sm:$0xff] }
 0x344   :  { %1143 = vmatpush.msra.mxu2 %v888_v37  ;;  %897 = vmatpush.msra.mxu0 %v886_v0  ;;  %v1000_v37 = vld [vmem:[#allocation5 + $0x118] sm:$0xff] }
 0x345   :  { %928 = vmatpush.msra.mxu1 %v821_v38  ;;  %1174 = vmatpush.msra.mxu3 %v823_v33  ;;  %v1003_v33 = vld [vmem:[#allocation5 + $0x130] sm:$0xff] }
 0x346   :  { %1527 = vmatmul.msk.f32.gmra.mxu1 %vm771_vm5, %v2291_v41  ;;  %1519 = vmatmul.msk.f32.gmra.mxu0 %vm771_vm5, %v769_v45 }
 0x347   :  { %929 = vmatpush.msra.mxu1 %v820_v47  ;;  %1535 = vmatmul.msk.f32.gmra.mxu2 %vm771_vm5, %v2299_v52 }
 0x348   :  { %1539 = vmatmul.msk.f32.gmra.mxu3 %vm771_vm5, %v769_v45  ;;  %1144 = vmatpush.msra.mxu2 %v887_v54  ;;  %v998_v45 = vld [vmem:[#allocation5 + $0x108] sm:$0xff] }
 0x349   :  { %930 = vmatpush.msra.mxu1 %v819_v55  ;;  %898 = vmatpush.msra.mxu0 %v885_v6 }
 0x34a   :  { %1145 = vmatpush.msra.mxu2 %v886_v0  ;;  %1175 = vmatpush.msra.mxu3 %v822_v36  ;;  %v1001_v36 = vld [vmem:[#allocation5 + $0x120] sm:$0xff] }
 0x34b   :  { %931 = vmatpush.msra.mxu1 %v818_v1  ;;  %899 = vmatpush.msra.mxu0 %v884_v12 }
 0x34c   :  { %1146 = vmatpush.msra.mxu2 %v885_v6  ;;  %1176 = vmatpush.msra.mxu3 %v821_v38  ;;  %v999_v38 = vld [vmem:[#allocation5 + $0x110] sm:$0xff] }
 0x34d   :  { %932 = vmatpush.msra.mxu1 %v817_v7  ;;  %900 = vmatpush.msra.mxu0 %v883_v16 }
 0x34e   :  { %1528 = vmatmul.msk.f32.gmra.mxu1 %vm771_vm5, %v2310_v8  ;;  %1520 = vmatmul.msk.f32.gmra.mxu0 %vm771_vm5, %v770_v9 }
 0x34f   :  { %933 = vmatpush.msra.mxu1 %v816_v10  ;;  %1536 = vmatmul.msk.f32.gmra.mxu2 %vm771_vm5, %v2318_v11 }
 0x350   :  { %1540 = vmatmul.msk.f32.gmra.mxu3 %vm771_vm5, %v770_v9  ;;  %1147 = vmatpush.msra.mxu2 %v884_v12 }
 0x351   :  { %934 = vmatpush.msra.mxu1 %v815_v15  ;;  %901 = vmatpush.msra.mxu0 %v882_v5 }
 0x352   :  { %1148 = vmatpush.msra.mxu2 %v883_v16  ;;  %1177 = vmatpush.msra.mxu3 %v820_v47  ;;  %v997_v47 = vld [vmem:[#allocation5 + $0x100] sm:$0xff] }
 0x353   :  { %935 = vmatpush.msra.mxu1 %v814_v3  ;;  %902 = vmatpush.msra.mxu0 %v881_v35 }
 0x354   :  { %1149 = vmatpush.msra.mxu2 %v882_v5  ;;  %1178 = vmatpush.msra.mxu3 %v819_v55 }
 0x355   :  { %936 = vmatpush.msra.mxu1 %v813_v13  ;;  %903 = vmatpush.msra.mxu0 %v880_v62 }
 0x356   :  { %1150 = vmatpush.msra.mxu2 %v881_v35  ;;  %1179 = vmatpush.msra.mxu3 %v818_v1 }
 0x357   :  { %1123 = vmatpush.msrb.mxu1 %v2236_v2  ;;  %904 = vmatpush.msra.mxu0 %v879_v22 }
 0x358   :  { %1151 = vmatpush.msra.mxu2 %v880_v62  ;;  %1180 = vmatpush.msra.mxu3 %v817_v7 }
 0x359   :  { %1124 = vmatpush.msrb.mxu1 %v2241_v58  ;;  %905 = vmatpush.msra.mxu0 %v878_v14 }
 0x35a   :  { %1152 = vmatpush.msra.mxu2 %v879_v22  ;;  %1181 = vmatpush.msra.mxu3 %v816_v10 }
 0x35b   :  { %1125 = vmatpush.msrb.mxu1 %v2244_v61  ;;  %906 = vmatpush.msra.mxu0 %v877_v20 }
 0x35c   :  { %1153 = vmatpush.msra.mxu2 %v878_v14  ;;  %1182 = vmatpush.msra.mxu3 %v815_v15 }
 0x35d   :  { %1126 = vmatpush.msrb.mxu1 %v2247_v17  ;;  %907 = vmatpush.msra.mxu0 %v876_v4 }
 0x35e   :  { %1154 = vmatpush.msra.mxu2 %v877_v20  ;;  %1183 = vmatpush.msra.mxu3 %v814_v3 }
 0x35f   :  { %1013 = vmatpush.msrb.mxu0 %v2330_v21 }
 0x360   :  { %1155 = vmatpush.msra.mxu2 %v876_v4  ;;  %1184 = vmatpush.msra.mxu3 %v813_v13 }
 0x361   :  { %1014 = vmatpush.msrb.mxu0 %v2332_v18 }
 0x362   :  { %1286 = vmatpush.msrb.mxu2 %v2005_v39  ;;  %1306 = vmatpush.msrb.mxu3 %v2005_v39 }
 0x363   :  { %1015 = vmatpush.msrb.mxu0 %v2335_v24 }
 0x364   :  { %1287 = vmatpush.msrb.mxu2 %v2012_v40  ;;  %1307 = vmatpush.msrb.mxu3 %v2012_v40 }
 0x365   :  { %1016 = vmatpush.msrb.mxu0 %v2338_v25 }
 0x366   :  { %1288 = vmatpush.msrb.mxu2 %v2019_v42  ;;  %1308 = vmatpush.msrb.mxu3 %v2019_v42 }
 0x367   :  { %1017 = vmatpush.msrb.mxu0 %v2341_v26 }
 0x368   :  { %1289 = vmatpush.msrb.mxu2 %v2026_v43  ;;  %1309 = vmatpush.msrb.mxu3 %v2026_v43 }
 0x369   :  { %1018 = vmatpush.msrb.mxu0 %v2346_v28 }
 0x36a   :  { %1290 = vmatpush.msrb.mxu2 %v2033_v44  ;;  %1310 = vmatpush.msrb.mxu3 %v2033_v44 }
 0x36b   :  { %1019 = vmatpush.msrb.mxu0 %v2351_v29 }
 0x36c   :  { %1291 = vmatpush.msrb.mxu2 %v2040_v46  ;;  %1311 = vmatpush.msrb.mxu3 %v2040_v46 }
 0x36d   :  { %1020 = vmatpush.msrb.mxu0 %v2356_v31 }
 0x36e   :  { %1292 = vmatpush.msrb.mxu2 %v2047_v48  ;;  %1312 = vmatpush.msrb.mxu3 %v2047_v48 }
 0x36f   :  { %1021 = vmatpush.msrb.mxu0 %v2361_v32 }
 0x370   :  { %1293 = vmatpush.msrb.mxu2 %v2054_v49  ;;  %1313 = vmatpush.msrb.mxu3 %v2054_v49 }
 0x371   :  { %1022 = vmatpush.msrb.mxu0 %v1003_v33 }
 0x372   :  { %1294 = vmatpush.msrb.mxu2 %v2061_v50  ;;  %1314 = vmatpush.msrb.mxu3 %v2061_v50 }
 0x373   :  { %1023 = vmatpush.msrb.mxu0 %v1002_v34 }
 0x374   :  { %1295 = vmatpush.msrb.mxu2 %v2068_v51  ;;  %1315 = vmatpush.msrb.mxu3 %v2068_v51 }
 0x375   :  { %1024 = vmatpush.msrb.mxu0 %v1001_v36 }
 0x376   :  { %1296 = vmatpush.msrb.mxu2 %v2075_v53  ;;  %1316 = vmatpush.msrb.mxu3 %v2075_v53 }
 0x377   :  { %1025 = vmatpush.msrb.mxu0 %v1000_v37 }
 0x378   :  { %1297 = vmatpush.msrb.mxu2 %v2082_v56  ;;  %1317 = vmatpush.msrb.mxu3 %v2082_v56 }
 0x379   :  { %1026 = vmatpush.msrb.mxu0 %v999_v38 }
 0x37a   :  { %1298 = vmatpush.msrb.mxu2 %v2089_v57  ;;  %1318 = vmatpush.msrb.mxu3 %v2089_v57 }
 0x37b   :  { %1027 = vmatpush.msrb.mxu0 %v998_v45 }
 0x37c   :  { %1299 = vmatpush.msrb.mxu2 %v2099_v59  ;;  %1319 = vmatpush.msrb.mxu3 %v2099_v59 }
 0x37d   :  { %1028 = vmatpush.msrb.mxu0 %v997_v47 }
 0x37e   :  { %1300 = vmatpush.msrb.mxu2 %v2104_v60  ;;  %1320 = vmatpush.msrb.mxu3 %v2104_v60 }
 0x380   :  { %1301 = vmatpush.msrb.mxu2 %v2117_v63  ;;  %1321 = vmatpush.msrb.mxu3 %v2117_v63 }
 0x3b3   :  { %v863_v54 = vpop.f32.mrf.mxu1  ;;  %v801_v55 = vpop.f32.mrf.mxu0 }
 0x3b4   :  { %908 = vmatmul.f32.vlgmr.msra.gmra.mxu0 %v863_v54  ;;  %937 = vmatmul.f32.vlgmr.msra.gmra.mxu1 %v801_v55 }
 0x3b5   :  { %1210 = vmatpush.msra.mxu0 %v2236_v2  ;;  %1227 = vmatpush.msra.mxu1 %v2330_v21 }
 0x3b7   :  { %1211 = vmatpush.msra.mxu0 %v2241_v58  ;;  %1228 = vmatpush.msra.mxu1 %v2332_v18 }
 0x3b9   :  { %1212 = vmatpush.msra.mxu0 %v2244_v61  ;;  %1229 = vmatpush.msra.mxu1 %v2335_v24 }
 0x3ba   :  { %v984_v61 = vpop.f32.mrf.mxu2 }
 0x3bb   :  { %1213 = vmatpush.msra.mxu0 %v2247_v17  ;;  %v866_v0 = vpop.f32.mrf.mxu1  ;;  %v804_v1 = vpop.f32.mrf.mxu0  ;;  %1230 = vmatpush.msra.mxu1 %v2338_v25 }
 0x3bc   :  { %911 = vmatmul.f32.gmra.mxu0 %v866_v0  ;;  %940 = vmatmul.f32.gmra.mxu1 %v804_v1 }
 0x3bd   :  { %1231 = vmatpush.msra.mxu1 %v2341_v26 }
 0x3bf   :  { %1232 = vmatpush.msra.mxu1 %v2346_v28 }
 0x3c1   :  { %1233 = vmatpush.msra.mxu1 %v2351_v29 }
 0x3c2   :  { %v987_v7 = vpop.f32.mrf.mxu2 }
 0x3c3   :  { %v869_v2 = vpop.f32.mrf.mxu1  ;;  %v807_v58 = vpop.f32.mrf.mxu0  ;;  %1234 = vmatpush.msra.mxu1 %v2356_v31 }
 0x3c4   :  { %914 = vmatmul.f32.gmra.mxu0 %v869_v2  ;;  %943 = vmatmul.f32.gmra.mxu1 %v807_v58 }
 0x3c5   :  { %1235 = vmatpush.msra.mxu1 %v2361_v32 }
 0x3c7   :  { %1236 = vmatpush.msra.mxu1 %v1003_v33 }
 0x3c9   :  { %1237 = vmatpush.msra.mxu1 %v1002_v34 }
 0x3cb   :  { %v872_v17 = vpop.f32.mrf.mxu1  ;;  %v810_v6 = vpop.f32.mrf.mxu0  ;;  %1238 = vmatpush.msra.mxu1 %v1001_v36 }
 0x3cc   :  { %917 = vmatmul.f32.gmra.mxu0 %v872_v17  ;;  %946 = vmatmul.f32.gmra.mxu1 %v810_v6 }
 0x3cd   :  { %1239 = vmatpush.msra.mxu1 %v1000_v37 }
 0x3cf   :  { %1240 = vmatpush.msra.mxu1 %v999_v38 }
 0x3d1   :  { %1241 = vmatpush.msra.mxu1 %v998_v45 }
 0x3d3   :  { %1242 = vmatpush.msra.mxu1 %v997_v47 }
 0x3d4   :  { %1029 = vmatmul.f32.vlgmr.msrb.gmra.mxu0 %v984_v61  ;;  %1541 = vmatmul.msk.f32.vlgmr.msrb.gmra.mxu1 %vm771_vm5, %v2252_v19  ;;  %v990_v19 = vpop.f32.mrf.mxu2 }
 0x3d5   :  { %1549 = vmatpush.xpose.msk.msrb.mxu0 %vm651_vm1, %v2005_v39  ;;  %1566 = vmatpush.xpose.msk.msrb.mxu1 %vm651_vm1, %v2005_v39 }
 0x3d9   :  { %1550 = vmatpush.xpose.msk.msrb.mxu0 %vm651_vm1, %v2012_v40  ;;  %1567 = vmatpush.xpose.msk.msrb.mxu1 %vm651_vm1, %v2012_v40 }
 0x3dc   :  { %1032 = vmatmul.f32.gmra.mxu0 %v987_v7  ;;  %1542 = vmatmul.msk.f32.gmra.mxu1 %vm771_vm5, %v2272_v27  ;;  %v993_v39 = vpop.f32.mrf.mxu2 }
 0x3dd   :  { %1551 = vmatpush.xpose.msk.msrb.mxu0 %vm651_vm1, %v2019_v42  ;;  %1568 = vmatpush.xpose.msk.msrb.mxu1 %vm651_vm1, %v2019_v42 }
 0x3e1   :  { %1552 = vmatpush.xpose.msk.msrb.mxu0 %vm651_vm1, %v2026_v43  ;;  %1569 = vmatpush.xpose.msk.msrb.mxu1 %vm651_vm1, %v2026_v43 }
 0x3e4   :  { %1035 = vmatmul.f32.gmra.mxu0 %v990_v19  ;;  %1543 = vmatmul.msk.f32.gmra.mxu1 %vm771_vm5, %v2291_v41 }
 0x3e5   :  { %1553 = vmatpush.xpose.msk.msrb.mxu0 %vm651_vm1, %v2033_v44  ;;  %1570 = vmatpush.xpose.msk.msrb.mxu1 %vm651_vm1, %v2033_v44 }
 0x3e9   :  { %1554 = vmatpush.xpose.msk.msrb.mxu0 %vm651_vm1, %v2040_v46  ;;  %1571 = vmatpush.xpose.msk.msrb.mxu1 %vm651_vm1, %v2040_v46 }
 0x3ec   :  { %1038 = vmatmul.f32.gmra.mxu0 %v993_v39  ;;  %1544 = vmatmul.msk.f32.gmra.mxu1 %vm771_vm5, %v2310_v8 }
 0x3ed   :  { %1555 = vmatpush.xpose.msk.msrb.mxu0 %vm651_vm1, %v2047_v48  ;;  %1572 = vmatpush.xpose.msk.msrb.mxu1 %vm651_vm1, %v2047_v48 }
 0x3f1   :  { %1556 = vmatpush.xpose.msk.msrb.mxu0 %vm651_vm1, %v2054_v49  ;;  %1573 = vmatpush.xpose.msk.msrb.mxu1 %vm651_vm1, %v2054_v49 }
 0x3f4   :  { %1545 = vmatmul.msk.f32.vlgmr.msra.gmra.mxu0 %vm771_vm5, %v2260_v23 }
 0x3f5   :  { %1557 = vmatpush.xpose.msk.msrb.mxu0 %vm651_vm1, %v2061_v50  ;;  %1574 = vmatpush.xpose.msk.msrb.mxu1 %vm651_vm1, %v2061_v50 }
 0x3f9   :  { %1558 = vmatpush.xpose.msk.msrb.mxu0 %vm651_vm1, %v2068_v51  ;;  %1575 = vmatpush.xpose.msk.msrb.mxu1 %vm651_vm1, %v2068_v51 }
 0x3fc   :  { %1546 = vmatmul.msk.f32.gmra.mxu0 %vm771_vm5, %v2280_v30 }
 0x3fd   :  { %1559 = vmatpush.xpose.msk.msrb.mxu0 %vm651_vm1, %v2075_v53  ;;  %1576 = vmatpush.xpose.msk.msrb.mxu1 %vm651_vm1, %v2075_v53 }
 0x401   :  { %1560 = vmatpush.xpose.msk.msrb.mxu0 %vm651_vm1, %v2082_v56  ;;  %1577 = vmatpush.xpose.msk.msrb.mxu1 %vm651_vm1, %v2082_v56 }
 0x404   :  { %1547 = vmatmul.msk.f32.gmra.mxu0 %vm771_vm5, %v2299_v52 }
 0x405   :  { %1561 = vmatpush.xpose.msk.msrb.mxu0 %vm651_vm1, %v2089_v57  ;;  %1578 = vmatpush.xpose.msk.msrb.mxu1 %vm651_vm1, %v2089_v57 }
 0x409   :  { %1562 = vmatpush.xpose.msk.msrb.mxu0 %vm651_vm1, %v2099_v59  ;;  %1579 = vmatpush.xpose.msk.msrb.mxu1 %vm651_vm1, %v2099_v59  ;;  %v1099_v59 = vpop.f32.mrf.mxu3 }
 0x40a   :  { %1185 = vmatmul.f32.vlgmr.msra.gmra.mxu3 %v1099_v59 }
 0x40c   :  { %1548 = vmatmul.msk.f32.gmra.mxu0 %vm771_vm5, %v2318_v11 }
 0x40d   :  { %1563 = vmatpush.xpose.msk.msrb.mxu0 %vm651_vm1, %v2104_v60  ;;  %1580 = vmatpush.xpose.msk.msrb.mxu1 %vm651_vm1, %v2104_v60 }
 0x411   :  { %1564 = vmatpush.xpose.msk.msrb.mxu0 %vm651_vm1, %v2117_v63  ;;  %1581 = vmatpush.xpose.msk.msrb.mxu1 %vm651_vm1, %v2117_v63  ;;  %v1102_v63 = vpop.f32.mrf.mxu3 }
 0x412   :  { %1188 = vmatmul.f32.gmra.mxu3 %v1102_v63 }
 0x419   :  { %v1105_v8 = vpop.f32.mrf.mxu3 }
 0x41a   :  { %1191 = vmatmul.f32.gmra.mxu3 %v1105_v8 }
 0x421   :  { %v1108_v12 = vpop.f32.mrf.mxu3 }
 0x422   :  { %1194 = vmatmul.f32.gmra.mxu3 %v1108_v12 }
 0x431   :  { %v909_v40 = vpop.f32.mrf.mxu0  ;;  %v938_v42 = vpop.f32.mrf.mxu1 }
 0x432   :  { %v939_v43 = vadd.f32 %v938_v42, %v909_v40 }
 0x439   :  { %v912_v44 = vpop.f32.mrf.mxu0  ;;  %v941_v46 = vpop.f32.mrf.mxu1 }
 0x43a   :  { %v942_v48 = vadd.f32 %v941_v46, %v912_v44 }
 0x441   :  { %v915_v49 = vpop.f32.mrf.mxu0  ;;  %v944_v50 = vpop.f32.mrf.mxu1 }
 0x442   :  { %v945_v51 = vadd.f32 %v944_v50, %v915_v49 }
 0x449   :  { %v918_v53 = vpop.f32.mrf.mxu0  ;;  %v947_v56 = vpop.f32.mrf.mxu1 }
 0x44a   :  { %v948_v57 = vadd.f32 %v947_v56, %v918_v53 }
 0x451   :  { %v1030_v60 = vpop.f32.mrf.mxu0  ;;  %v1128_v23 = vpop.f32.mrf.mxu1 }
 0x452   :  { %v2482_v27 = vadd.f32 %v1030_v60, %v939_v43  ;;  %1156 = vmatmul.f32.vlgmr.msra.gmra.mxu2 %v1128_v23 }
 0x454   :  { %v1056_v28 = vmul.f32 %v2482_v27, %v2482_v27 }
 0x459   :  { %v1033_v30 = vpop.f32.mrf.mxu0  ;;  %v1131_v41 = vpop.f32.mrf.mxu1 }
 0x45a   :  { %v2484_v52 = vadd.f32 %v1033_v30, %v942_v48  ;;  %1159 = vmatmul.f32.gmra.mxu2 %v1131_v41 }
 0x45c   :  { %v1057_v26 = vmul.f32 %v2484_v52, %v2484_v52  ;;  %v1046_v29 = vadd.f32 %v2484_v52, %v2482_v27 }
 0x45e   :  { %v1060_v32 = vadd.f32 %v1057_v26, %v1056_v28 }
 0x461   :  { %v1036_v9 = vpop.f32.mrf.mxu0  ;;  %v1134_v10 = vpop.f32.mrf.mxu1 }
 0x462   :  { %v2486_v11 = vadd.f32 %v1036_v9, %v945_v51  ;;  %1162 = vmatmul.f32.gmra.mxu2 %v1134_v10 }
 0x464   :  { %v1058_v31 = vmul.f32 %v2486_v11, %v2486_v11  ;;  %v1047_v33 = vadd.f32 %v1046_v29, %v2486_v11 }
 0x466   :  { %v1061_v37 = vadd.f32 %v1060_v32, %v1058_v31 }
 0x469   :  { %v1039_v15 = vpop.f32.mrf.mxu0  ;;  %v1137_v16 = vpop.f32.mrf.mxu1 }
 0x46a   :  { %v2488_v3 = vadd.f32 %v1039_v15, %v948_v57  ;;  %1165 = vmatmul.f32.gmra.mxu2 %v1137_v16 }
 0x46c   :  { %v1059_v34 = vmul.f32 %v2488_v3, %v2488_v3  ;;  %v1048_v38 = vadd.f32 %v1047_v33, %v2488_v3 }
 0x46e   :  { %v1062_v55 = vadd.f32 %v1061_v37, %v1059_v34  ;;  %v1049_v58 = vrot.slane %v1048_v38, 4 }
 0x470   :  { %v1063_v6 = vrot.slane %v1062_v55, 4  ;;  %v1050_v39 = vadd.f32 %v1049_v58, %v1048_v38  ;;  %v1285_v58 = vld [vmem:[%s2552_s8] sm:$0x1] }
 0x471   :  { %v1215_v5 = vpop.f32.mrf.mxu0 }
 0x472   :  { %1243 = vmatmul.f32.vlgmr.msra.gmra.mxu1 %v1215_v5  ;;  %v1064_v46 = vadd.f32 %v1063_v6, %v1062_v55  ;;  %v1051_v51 = vrot.slane %v1050_v39, 2 }
 0x474   :  { %v1065_v59 = vrot.slane %v1064_v46, 2  ;;  %v1052_v63 = vadd.f32 %v1051_v51, %v1050_v39 }
 0x476   :  { %v1066_v8 = vadd.f32 %v1065_v59, %v1064_v46  ;;  %v1053_v12 = vrot.slane %v1052_v63, 1 }
 0x478   :  { %v1067_v5 = vrot.slane %v1066_v8, 1 }
 0x479   :  { %v1218_v13 = vpop.f32.mrf.mxu0 }
 0x47a   :  { %1246 = vmatmul.f32.gmra.mxu1 %v1218_v13 }
 0x481   :  { %v1221_v35 = vpop.f32.mrf.mxu0 }
 0x482   :  { %1249 = vmatmul.f32.gmra.mxu1 %v1221_v35 }
 0x489   :  { %v1224_v62 = vpop.f32.mrf.mxu0 }
 0x48a   :  { %1252 = vmatmul.f32.gmra.mxu1 %v1224_v62  ;;  %v1054_v62 = vadd.f32 %v1053_v12, %v1052_v63 }
 0x48d   :  { %v1186_v22 = vpop.f32.mrf.mxu3 }
 0x495   :  { %v1189_v20 = vpop.f32.mrf.mxu3 }
 0x49d   :  { %v1192_v18 = vpop.f32.mrf.mxu3 }
 0x4a5   :  { %v1195_v2 = vpop.f32.mrf.mxu3 }
 0x4d5   :  { %v1157_v14 = vpop.f32.mrf.mxu2 }
 0x4d6   :  { %v1187_v45 = vadd.f32 %v1186_v22, %v1157_v14 }
 0x4dd   :  { %v1160_v4 = vpop.f32.mrf.mxu2 }
 0x4de   :  { %v1190_v36 = vadd.f32 %v1189_v20, %v1160_v4  ;;  %v1068_v20 = vadd.f32 %v1067_v5, %v1066_v8 }
 0x4e5   :  { %v1163_v25 = vpop.f32.mrf.mxu2 }
 0x4e6   :  { %v1193_v47 = vadd.f32 %v1192_v18, %v1163_v25 }
 0x4ed   :  { %v1166_v1 = vpop.f32.mrf.mxu2 }
 0x4ee   :  { %v1196_v19 = vadd.f32 %v1195_v2, %v1166_v1 }
 0x4ef   :  { %v1244_v21 = vpop.f32.mrf.mxu1 }
 0x4f0   :  { %v2504_v61 = vadd.f32 %v1244_v21, %v1187_v45 }
 0x4f2   :  { %v1270_v40 = vmul.f32 %v2504_v61, %v2504_v61 }
 0x4f7   :  { %v1247_v24 = vpop.f32.mrf.mxu1 }
 0x4f8   :  { %v2502_v0 = vadd.f32 %v1247_v24, %v1190_v36 }
 0x4fa   :  { %v1271_v7 = vmul.f32 %v2502_v0, %v2502_v0  ;;  %v1260_v42 = vadd.f32 %v2502_v0, %v2504_v61 }
 0x4fc   :  { %v1274_v48 = vadd.f32 %v1271_v7, %v1270_v40 }
 0x4ff   :  { %v1250_v54 = vpop.f32.mrf.mxu1 }
 0x500   :  { %v2506_v17 = vadd.f32 %v1250_v54, %v1193_v47  ;;  %v1284_v54 = vld [vmem:[%s2551_s7] sm:$0x1]  ;;  %s1674_s7 = smov [#allocation7]  }
 0x501   :  { %s1433_s8 = sshll.u32 %s1674_s7, 4  ;;  %s1434_s8 = int_to_ptr.vmem [resolvable:$true] %s1433_s8 }
 0x502   :  { %v1272_v43 = vmul.f32 %v2506_v17, %v2506_v17  ;;  %v1261_v49 = vadd.f32 %v1260_v42, %v2506_v17 }
 0x504   :  { %v1275_v53 = vadd.f32 %v1274_v48, %v1272_v43 }
 0x507   :  { %v1253_v44 = vpop.f32.mrf.mxu1 }
 0x508   :  { %v2517_v50 = vadd.f32 %v1253_v44, %v1196_v19 }
 0x50a   :  { %v1262_v56 = vadd.f32 %v1261_v49, %v2517_v50  ;;  %v1273_v57 = vmul.f32 %v2517_v50, %v2517_v50 }
 0x50c   :  { %v1263_v60 = vrot.slane %v1262_v56, 4  ;;  %v1276_v23 = vadd.f32 %v1275_v53, %v1273_v57 }
 0x50e   :  { %v1264_v30 = vadd.f32 %v1263_v60, %v1262_v56  ;;  %v1277_v41 = vrot.slane %v1276_v23, 4 }
 0x510   :  { %v1265_v9 = vrot.slane %v1264_v30, 2  ;;  %v1278_v10 = vadd.f32 %v1277_v41, %v1276_v23 }
 0x512   :  { %v1266_v15 = vadd.f32 %v1265_v9, %v1264_v30  ;;  %v1279_v16 = vrot.slane %v1278_v10, 2 }
 0x514   :  { %v1267_v13 = vrot.slane %v1266_v15, 1  ;;  %v1280_v35 = vadd.f32 %v1279_v16, %v1278_v10 }
 0x516   :  { %v1268_v22 = vadd.f32 %v1267_v13, %v1266_v15  ;;  %v1281_v14 = vrot.slane %v1280_v35, 1 }
 0x518   :  { %v1282_v4 = vadd.f32 %v1281_v14, %v1280_v35  ;;  %v1269_v21 = vadd.f32 %v1268_v22, %v1054_v62 }
 0x51a   :  { %1302 = vmatmul.f32.vlgmr.msrb.gmra.mxu2 %v1269_v21  ;;  %v1283_v18 = vadd.f32 %v1282_v4, %v1068_v20 }
 0x51c   :  { %1322 = vmatmul.f32.vlgmr.msrb.gmra.mxu3 %v1283_v18 }
 0x59d   :  { %v1303_v24 = vpop.f32.mrf.mxu2 }
 0x59e   :  { %v1326_v25 = vmul.f32 0.00048828125, %v1303_v24 }
 0x59f   :  { %v1323_v26 = vpop.f32.mrf.mxu3 }
 0x5a0   :  { %v1328_v28 = vmul.f32 %v1326_v25, %v1326_v25  ;;  %v1327_v29 = vmul.f32 0.00048828125, %v1323_v26  ;;  %1565 = vmatmul.msk.f32.vlgmr.msrb.gmra.mxu0 %vm651_vm1, %v1326_v25 }
 0x5a2   :  { %v1329_v31 = vsub.f32 %v1327_v29, %v1328_v28 }
 0x5a4   :  { %v1330_v32 = vadd.f32 1e-05, %v1329_v31 }
 0x5a6   :  { %1590 = vrsqrt.f32 %v1330_v32  ;;  %vm1337_vm7 = vweird.f32 %v1330_v32 }
 0x5ac   :  { %v1591_v33 = vpop.eup %1590 }
 0x5ad   :  { %v1332_v34 = vmul.f32 %v1591_v33, %v1330_v32  ;;  %vm1338_vm6 = vweird.f32 %v1591_v33 }
 0x5ae   :  { %vm1339_vm8 = vmor %vm1337_vm7, %vm1338_vm6 }
 0x5af   :  { %v1333_v36 = vmul.f32 %v1591_v33, %v1332_v34 }
 0x5b1   :  { %v1334_v37 = vmul.f32 0.5, %v1333_v36 }
 0x5b3   :  { %v1335_v38 = vsub.f32 1.5, %v1334_v37 }
 0x5b5   :  { %v1336_v45 = vmul.f32 %v1591_v33, %v1335_v38 }
 0x5b7   :  { %v1340_v47 = vsel %vm1339_vm8, %v1591_v33, %v1336_v45 }
 0x5b8   :  { %1582 = vmatmul.msk.f32.vlgmr.msrb.gmra.mxu1 %vm651_vm1, %v1340_v47 }
 0x61d   :  { %v1361_v2 = vpop.f32.mrf.mxu0 }
 0x635   :  { %v1384_v55 = vpop.f32.mrf.mxu1 }
 0x636   :  { %v1387_v1 = vmul.f32 %v1384_v55, %v1284_v54 }
 0x638   :  { %v1388_v6 = vmul.f32 %v1387_v1, %v1361_v2  ;;  %v1391_v7 = vperm.slane %v1387_v1, 0 }
 0x63a   :  { %v1389_v19 = vsub.f32 %v1285_v58, %v1388_v6  ;;  %v1393_v39 = vmul.f32 %v1391_v7, %v2482_v27  ;;  %v1394_v42 = vmul.f32 %v1391_v7, %v2484_v52  ;;  %v1395_v43 = vmul.f32 %v1391_v7, %v2486_v11 }
 0x63b   :  { %v1396_v44 = vmul.f32 %v1391_v7, %v2488_v3  ;;  %v1412_v46 = vmul.f32 %v1391_v7, %v2504_v61  ;;  %v1413_v48 = vmul.f32 %v1391_v7, %v2502_v0  ;;  %v1414_v49 = vmul.f32 %v1391_v7, %v2506_v17 }
 0x63c   :  { %v1398_v40 = vperm.slane %v1389_v19, 0  ;;  %v1415_v59 = vmul.f32 %v1391_v7, %v2517_v50 }
 0x63e   :  { %v1400_v51 = vadd.f32 %v1398_v40, %v1393_v39  ;;  %v1401_v53 = vadd.f32 %v1398_v40, %v1394_v42  ;;  %v1402_v56 = vadd.f32 %v1398_v40, %v1395_v43  ;;  %v1403_v57 = vadd.f32 %v1398_v40, %v1396_v44 }
 0x63f   :  { %v1416_v27 = vadd.f32 %v1412_v46, %v1398_v40  ;;  %v1417_v60 = vadd.f32 %v1413_v48, %v1398_v40  ;;  %v1418_v11 = vadd.f32 %v1414_v49, %v1398_v40  ;;  %v1419_v3 = vadd.f32 %v1415_v59, %v1398_v40 }
 0x640   :  { %v1404_v23 = vmax.f32 %v1400_v51, 0.0  ;;  %v1405_v52 = vmax.f32 %v1401_v53, 0.0  ;;  %v1406_v63 = vmax.f32 %v1402_v56, 0.0  ;;  %v1407_v30 = vmax.f32 %v1403_v57, 0.0 }
 0x641   :  { %v1420_v61 = vmax.f32 %v1416_v27, 0.0  ;;  %v1421_v0 = vmax.f32 %v1417_v60, 0.0  ;;  %v1422_v17 = vmax.f32 %v1418_v11, 0.0  ;;  %v1423_v50 = vmax.f32 %v1419_v3, 0.0 }
 0x642   :  { %1408 = vst [vmem:[#allocation7] sm:$0xff] %v1404_v23 }
 0x643   :  { %1409 = vst [vmem:[#allocation7 + $0x8] sm:$0xff] %v1405_v52 }
 0x644   :  { %1410 = vst [vmem:[#allocation7 + $0x10] sm:$0xff] %v1406_v63 }
 0x645   :  { %1411 = vst [vmem:[#allocation7 + $0x18] sm:$0xff] %v1407_v30 }
 0x646   :  { %1425 = vst [vmem:[#allocation7 + $0x20] sm:$0xff] %v1420_v61 }
 0x647   :  { %1426 = vst [vmem:[#allocation7 + $0x28] sm:$0xff] %v1421_v0 }
 0x648   :  { %1427 = vst [vmem:[#allocation7 + $0x30] sm:$0xff] %v1422_v17 }
 0x649   :  { %1428 = vst [vmem:[#allocation7 + $0x38] sm:$0xff] %v1423_v50 }
 0x64a   :  { %1441 = dma.vmem_to_hbm [thread:$0]  %s1434_s8, 1024, %s1436_s28, [#allocation4], %s1671_s21, %s1671_s21, %s1672_s22  }
 0x64b   :  { %1668 = dma.done.wait [#allocation4], 1024  }
 0x64c   :  { %1669 = vsyncadd [#allocation4], 4294966272 }
 0x64d   :  { %1446 = vsyncpa [#allocation3], 1 }
 0x64e   :  { %1447 = vsyncpa [#allocation6], 1 }
 0x64f   :  { %1448 = vsyncpa [#allocation4], 1 }

</bundles_post_ra>
